<compile_context>
chip_gen: v7x
topology: tpu7x:2x2x1
jax: 0.10.0
libtpu: 0.0.40
codegen_flags: <defaults>
</compile_context>

<pallas_src>
import functools

import jax
import jax.numpy as jnp
from jax.experimental import pallas as pl
from jax.experimental.pallas import tpu as pltpu

LN_EPS = 1e-6          # matches nn.LayerNorm(eps=1e-06)
NEG_FILL = -10000.0    # matches masked_fill / energy_expanded fill value


def _to_bf16(x):
    return x.astype(jnp.bfloat16)


def _sigmoid(x):
    # 1 / (1 + exp(-x)); exp + reciprocal both run on the EUP slot.
    return pl.reciprocal(1.0 + jnp.exp(-x), approx=True)


def _layer_norm(x, gamma, beta):
    mean = jnp.mean(x, axis=-1, keepdims=True)
    var = jnp.mean(jnp.square(x - mean), axis=-1, keepdims=True)
    return (x - mean) * jax.lax.rsqrt(var + LN_EPS) * gamma + beta


def _const_spec(a):
    # grid-invariant operand: full block, same block index every grid step
    return pl.BlockSpec(a.shape, lambda *_: (0,) * a.ndim)


def _param_bytes(arrs):
    return int(sum(int(a.size) * a.dtype.itemsize for a in arrs))


def _compiler_params(dims):
    # Per-generation VMEM budget: ~85% of physical, capped at 100 MiB
    # (v7x: 64 MiB physical -> ~54 MiB; v5e/v6e: 128 MiB -> 100 MiB).
    try:
        cap = int(pltpu.get_tpu_info().vmem_capacity_bytes)
    except Exception:
        cap = 64 * 1024 * 1024
    limit = int(min(int(cap * 0.85), 100 * 1024 * 1024))
    return pltpu.CompilerParams(dimension_semantics=dims, vmem_limit_bytes=limit)


def _pick_q_tile(L):
    if L <= 256:
        return L
    for t in (256, 128, 64, 32, 16, 8):
        if L % t == 0:
            return t
    return L


# ---------------------------------------------------------------------------
# Kernel A: FastSelfAttentionEnc + ffn_fast (one batch element per grid step)
# ---------------------------------------------------------------------------
def _loc_attn_ffn_kernel(x_ref,
                         wglu_ref, bglu_ref, wpe_ref, bpe_ref, stt_ref, wfc_ref,
                         g1_ref, b1_ref,
                         w1_ref, b1f_ref, w2_ref, b2f_ref,
                         g2_ref, b2_ref,
                         out_ref,
                         *, n_head, d_conv, kernel_size):
    H, dc, K = n_head, d_conv, kernel_size
    c0 = (K - 1) // 2
    x = x_ref[0]                                          # (L, D) f32
    L, D = x.shape
    residual = x
    # explicit head-batch for the batched matmuls (einsum needs matching batch dims)
    xb = jnp.broadcast_to(_to_bf16(x)[None], (H, L, D))   # (H, L, D) bf16

    # ---- GLU: a/g fused in one per-head matmul, produced transposed: (H, 2dc, L) ----
    glu = jnp.einsum('hnd,hld->hnl', wglu_ref[...], xb,
                     preferred_element_type=jnp.float32) + bglu_ref[...]
    conv = glu[:, :dc, :] * _sigmoid(glu[:, dc:, :])      # (H, dc, L) f32
    conv_bf = _to_bf16(conv)

    # ---- predict_energy: dyn/gate fused; head-shared weight DMA'd once, broadcast here ----
    wpe_b = jnp.broadcast_to(wpe_ref[...][None], (H, 2 * K, dc))
    pe = jnp.einsum('hkc,hcl->hkl', wpe_b, conv_bf,
                    preferred_element_type=jnp.float32) + bpe_ref[...]   # (H, 2K, L)
    energy = _sigmoid(pe[:, K:, :]) * pe[:, :K, :] + stt_ref[...]        # (H, K, L)

    # ---- softmax over the virtual expanded row of length L+K-1 (off-band fill = -1e4) ----
    m = jnp.maximum(jnp.max(energy, axis=1, keepdims=True), NEG_FILL)    # (H, 1, L)
    p = jnp.exp(energy - m)                                              # (H, K, L)
    fill = jnp.exp(NEG_FILL - m)
    inv_denom = pl.reciprocal(jnp.sum(p, axis=1, keepdims=True)
                              + float(L - 1) * fill, approx=True)        # (H, 1, L)

    # ---- band-local apply: never materializes an (H, L, L) attention map ----
    #      ctx[h, c, l] = sum_j p[h, j, l] * conv[h, c, l + j - c0]  (zero outside [0, L))
    #      off-band fill contributions are exp(-1e4 - m)/denom ~ 0 in f32 and are dropped.
    pad_l = jnp.zeros((H, dc, c0), jnp.float32)
    pad_r = jnp.zeros((H, dc, K - 1 - c0), jnp.float32)
    conv_pad = jnp.concatenate([pad_l, conv, pad_r], axis=2)             # (H, dc, L+K-1)
    ctx = p[:, 0:1, :] * conv_pad[:, :, 0:L]
    for j in range(1, K):                                                # K static shifted MACs
        ctx = ctx + p[:, j:j + 1, :] * conv_pad[:, :, j:j + L]
    ctx = ctx * inv_denom                                                # (H, dc, L) f32

    # ---- fc over concatenated heads as ONE full-depth matmul: (L, H*dc) @ (H*dc, D) ----
    ctx_flat = ctx.reshape(H * dc, L)          # leading-dim collapse (layout preserving)
    v_loc = jnp.dot(_to_bf16(ctx_flat.T), wfc_ref[...],
                    preferred_element_type=jnp.float32) + residual       # (L, D)
    y1 = _layer_norm(v_loc, g1_ref[...], b1_ref[...])

    # ---- PositionwiseFeedForward (ffn_fast) ----
    h1 = jnp.maximum(jnp.dot(_to_bf16(y1), w1_ref[...],
                             preferred_element_type=jnp.float32) + b1f_ref[...], 0.0)
    y2 = jnp.dot(_to_bf16(h1), w2_ref[...],
                 preferred_element_type=jnp.float32) + b2f_ref[...] + y1
    out_ref[0] = _layer_norm(y2, g2_ref[...], b2_ref[...])


def local_attn_ffn_forward(x, params):
    """x: (B, L, D) f32 -> (B, L, D) f32. Fused FastSelfAttentionEnc + ffn_fast."""
    weights = list(params[:-3])
    n_head, d_conv, ksize = params[-3:]
    B, L, D = x.shape
    d_inner = weights[8].shape[1]          # w1f

    kernel = functools.partial(_loc_attn_ffn_kernel,
                               n_head=n_head, d_conv=d_conv, kernel_size=ksize)

    flops = (2 * B * L * (2 * D * D                      # GLU
                          + n_head * d_conv * 2 * ksize  # predict_energy
                          + D * D                        # fc
                          + 2 * D * d_inner)             # ffn_fast
             + 2 * B * n_head * ksize * L * d_conv)      # band-local apply (VPU)
    transcendentals = B * L * (D + 3 * n_head * ksize + n_head + 2)
    ce = pl.CostEstimate(flops=int(flops), transcendentals=int(transcendentals),
                         bytes_accessed=int(2 * B * L * D * 4 + _param_bytes(weights)))

    return pl.pallas_call(
        kernel,
        out_shape=jax.ShapeDtypeStruct((B, L, D), jnp.float32),
        grid_spec=pltpu.PrefetchScalarGridSpec(
            num_scalar_prefetch=0,
            grid=(B,),
            in_specs=[pl.BlockSpec((1, L, D), lambda b: (b, 0, 0))]
                     + [_const_spec(w) for w in weights],
            out_specs=pl.BlockSpec((1, L, D), lambda b: (b, 0, 0)),
        ),
        compiler_params=_compiler_params(("parallel",)),
        cost_estimate=ce,
    )(x, *weights)


# ---------------------------------------------------------------------------
# Kernel B: MultiHeadAttention (self-attn) + ffn, q-tiled (grid = (B, L // Lq))
# ---------------------------------------------------------------------------
def _make_mha_ffn_kernel(has_qmask, has_kmask, n_head, d_k, d_v, q_tile):
    H, dk, dv, Lq = n_head, d_k, d_v, q_tile

    def kernel(*refs):
        it = iter(refs)
        xfull_ref = next(it)                              # (1, L, D)   full rows (for K/V)
        xq_ref = next(it)                                 # (1, Lq, D)  this q tile (residual)
        qmask_ref = next(it) if has_qmask else None
        kmask_ref = next(it) if has_kmask else None
        (wqkv_ref, wfc_ref, ga_ref, ba_ref,
         w1_ref, b1_ref, w2_ref, b2_ref, gf_ref, bf_ref) = [next(it) for _ in range(10)]
        out_ref = next(it)
        attn_ref = next(it)
        q_s = next(it)                                    # VMEM (H, L, dk)      bf16
        kv_s = next(it)                                   # VMEM (H, L, dk+dv)   bf16

        qi = pl.program_id(1)

        # fused q/k/v projection once per batch row; 1/sqrt(dk) already folded into wq
        @pl.when(qi == 0)
        def _():
            x_full = xfull_ref[0]                         # (L, D) f32
            xb = jnp.broadcast_to(_to_bf16(x_full)[None], (H,) + x_full.shape)
            proj = jnp.einsum('hld,hdn->hln', xb, wqkv_ref[...],
                              preferred_element_type=jnp.float32)   # (H, L, 2dk+dv)
            pbf = _to_bf16(proj)
            q_s[...] = pbf[:, :, :dk]
            kv_s[...] = pbf[:, :, dk:]

        q_start = pl.multiple_of(qi * Lq, Lq)
        q = q_s[:, pl.ds(q_start, Lq), :]                 # (H, Lq, dk) bf16 (pre-scaled)
        kv = kv_s[...]
        k = kv[:, :, :dk]                                 # (H, L, dk) bf16
        v = kv[:, :, dk:]                                 # (H, L, dv) bf16

        s = jnp.einsum('hqd,hkd->hqk', q, k,
                       preferred_element_type=jnp.float32)           # (H, Lq, L) f32
        if has_kmask:
            s = jnp.where(kmask_ref[0][None] > 0.0, NEG_FILL, s)

        # softmax (f32) with EUP reciprocal
        m = jnp.max(s, axis=-1, keepdims=True)
        p = jnp.exp(s - m)
        attn = p * pl.reciprocal(jnp.sum(p, axis=-1, keepdims=True), approx=True)
        attn_bf = _to_bf16(attn)

        ctx = jnp.einsum('hqk,hkd->hqd', attn_bf, v,
                         preferred_element_type=jnp.float32)          # (H, Lq, dv)
        ctx_bf = _to_bf16(ctx)
        # output projection: per-head matmuls accumulated in f32 (no (H, Lq, D) f32
        # intermediate, no cross-head VPU reduce) — same lowering Mosaic uses for a
        # batched dot, minus the big live tensor.
        proj = jnp.dot(ctx_bf[0], wfc_ref[0], preferred_element_type=jnp.float32)
        for h in range(1, H):
            proj = proj + jnp.dot(ctx_bf[h], wfc_ref[h], preferred_element_type=jnp.float32)

        residual = xq_ref[0]                                          # (Lq, D) f32
        y = _layer_norm(proj + residual, ga_ref[...], ba_ref[...])

        # qmask is applied only to the *returned* attention map (as in torch)
        if has_qmask:
            attn = jnp.where(qmask_ref[0][None] > 0.0, 0.0, attn)
        attn_ref[0] = attn                                            # lane-dense (H, Lq, L)

        # ---- PositionwiseFeedForward (ffn) ----
        h1 = jnp.maximum(jnp.dot(_to_bf16(y), w1_ref[...],
                                 preferred_element_type=jnp.float32) + b1_ref[...], 0.0)
        y2 = jnp.dot(_to_bf16(h1), w2_ref[...],
                     preferred_element_type=jnp.float32) + b2_ref[...] + y
        out_ref[0] = _layer_norm(y2, gf_ref[...], bf_ref[...])

    return kernel


def mha_ffn_forward(x, params, qmask=None, kmask=None, q_tile=None):
    """Self multi-head attention + ffn. Returns (out (B,L,D), attn (B,H,L,L))."""
    weights = list(params[:-3])
    n_head, d_k, d_v = params[-3:]
    B, L, D = x.shape
    d_inner = weights[4].shape[1]          # w1

    Lq = _pick_q_tile(L) if q_tile is None else q_tile
    assert L % Lq == 0 and (Lq == L or Lq % 8 == 0), "q tile must divide L (multiple of 8)"
    n_q = L // Lq

    has_q, has_k = qmask is not None, kmask is not None
    kernel = _make_mha_ffn_kernel(has_q, has_k, n_head, d_k, d_v, Lq)

    operands = [x, x]
    in_specs = [pl.BlockSpec((1, L, D), lambda b, qi: (b, 0, 0)),     # full rows for K/V
                pl.BlockSpec((1, Lq, D), lambda b, qi: (b, qi, 0))]   # q-tile rows (residual)
    mask_bytes = 0
    if has_q:
        qm = jnp.asarray(qmask).astype(jnp.bfloat16)                  # masks DMA'd as bf16
        operands.append(qm)
        in_specs.append(pl.BlockSpec((1, Lq, L), lambda b, qi: (b, qi, 0)))
        mask_bytes += int(qm.size) * 2
    if has_k:
        km = jnp.asarray(kmask).astype(jnp.bfloat16)
        operands.append(km)
        in_specs.append(pl.BlockSpec((1, Lq, L), lambda b, qi: (b, qi, 0)))
        mask_bytes += int(km.size) * 2
    operands += weights
    in_specs += [_const_spec(w) for w in weights]

    flops = (2 * B * L * n_head * D * (2 * d_k + d_v)    # fused q/k/v projection
             + 2 * B * n_head * L * L * (d_k + d_v)      # scores + context
             + 2 * B * L * n_head * d_v * D              # output projection
             + 4 * B * L * D * d_inner)                  # ffn
    transcendentals = B * (n_head * L * L + 2 * L)
    ce = pl.CostEstimate(
        flops=int(flops), transcendentals=int(transcendentals),
        bytes_accessed=int(2 * B * L * D * 4 + B * n_head * L * L * 4
                           + mask_bytes + _param_bytes(weights)))

    out, attn = pl.pallas_call(
        kernel,
        out_shape=(jax.ShapeDtypeStruct((B, L, D), jnp.float32),
                   jax.ShapeDtypeStruct((B, n_head, L, L), jnp.float32)),
        grid_spec=pltpu.PrefetchScalarGridSpec(
            num_scalar_prefetch=0,
            grid=(B, n_q),
            in_specs=in_specs,
            out_specs=(pl.BlockSpec((1, Lq, D), lambda b, qi: (b, qi, 0)),
                       pl.BlockSpec((1, n_head, Lq, L), lambda b, qi: (b, 0, qi, 0))),
            scratch_shapes=[pltpu.VMEM((n_head, L, d_k), jnp.bfloat16),
                            pltpu.VMEM((n_head, L, d_k + d_v), jnp.bfloat16)],
        ),
        compiler_params=_compiler_params(("parallel", "arbitrary")),
        cost_estimate=ce,
    )(*operands)
    return out, attn


# ---------------------------------------------------------------------------
# Parameter construction (torch-like shapes, rearranged to the kernel layouts)
# ---------------------------------------------------------------------------
def init_encoder_layer_params(key, d_model, d_inner, n_head, d_k, d_v, kernel_size=15):
    d_conv = d_v                         # EncoderLayer passes d_v as d_conv
    assert d_model == n_head * d_conv, "FastSelfAttentionEnc needs d_model == n_head*d_v"
    f32, bf16 = jnp.float32, jnp.bfloat16
    H, dc, K, D = n_head, d_conv, kernel_size, d_model
    ks = jax.random.split(key, 16)
    s = 0.02

    # ----- FastSelfAttentionEnc (multi_head_loc) -----
    wglu = s * jax.random.normal(ks[0], (D, 2 * D), f32)           # (in, out)
    bglu = s * jax.random.normal(ks[1], (2 * D,), f32)
    wpe = s * jax.random.normal(ks[2], (dc, 2 * K), f32)
    bpe = s * jax.random.normal(ks[3], (2 * K,), f32)
    stt = jnp.ones((H, K, 1), f32)                                  # stt_energy
    wfc_loc = (s * jax.random.normal(ks[4], (D, D), f32)).astype(bf16)
    g1 = jnp.ones((1, D), f32); b1 = jnp.zeros((1, D), f32)

    wa = jnp.transpose(wglu[:, :D].reshape(D, H, dc), (1, 2, 0))    # (H, dc, D)
    wg = jnp.transpose(wglu[:, D:].reshape(D, H, dc), (1, 2, 0))
    wglu_t = jnp.concatenate([wa, wg], axis=1).astype(bf16)         # (H, 2dc, D) a/g fused
    bglu_t = jnp.concatenate([bglu[:D].reshape(H, dc),
                              bglu[D:].reshape(H, dc)], axis=1)[:, :, None]  # (H, 2dc, 1)
    wpe_t = wpe.T.astype(bf16)                                      # (2K, dc) dyn/gate fused
    bpe_t = bpe.reshape(1, 2 * K, 1)

    # ----- ffn_fast -----
    w1f = (s * jax.random.normal(ks[5], (D, d_inner), f32)).astype(bf16)
    b1f = s * jax.random.normal(ks[6], (1, d_inner), f32)
    w2f = (s * jax.random.normal(ks[7], (d_inner, D), f32)).astype(bf16)
    b2f = s * jax.random.normal(ks[8], (1, D), f32)
    g2 = jnp.ones((1, D), f32); b2 = jnp.zeros((1, D), f32)

    loc_ffn_params = (wglu_t, bglu_t, wpe_t, bpe_t, stt, wfc_loc, g1, b1,
                      w1f, b1f, w2f, b2f, g2, b2, H, dc, K)

    # ----- MultiHeadAttention (q/k/v fused; 1/sqrt(d_k) folded into wq) -----
    wq = s * jax.random.normal(ks[9], (D, H * d_k), f32) * (d_k ** -0.5)
    wk = s * jax.random.normal(ks[10], (D, H * d_k), f32)
    wv = s * jax.random.normal(ks[11], (D, H * d_v), f32)
    wq_r = jnp.transpose(wq.reshape(D, H, d_k), (1, 0, 2))
    wk_r = jnp.transpose(wk.reshape(D, H, d_k), (1, 0, 2))
    wv_r = jnp.transpose(wv.reshape(D, H, d_v), (1, 0, 2))
    wqkv = jnp.concatenate([wq_r, wk_r, wv_r], axis=2).astype(bf16)  # (H, D, 2dk+dv)
    wfc = s * jax.random.normal(ks[12], (H * d_v, D), f32)
    wfc_r = wfc.reshape(H, d_v, D).astype(bf16)
    ga = jnp.ones((1, D), f32); ba = jnp.zeros((1, D), f32)

    # ----- ffn -----
    w1 = (s * jax.random.normal(ks[13], (D, d_inner), f32)).astype(bf16)
    b1_ = s * jax.random.normal(ks[14], (1, d_inner), f32)
    w2 = (s * jax.random.normal(ks[15], (d_inner, D), f32)).astype(bf16)
    b2_ = jnp.zeros((1, D), f32)
    gf = jnp.ones((1, D), f32); bf_ = jnp.zeros((1, D), f32)

    mha_ffn_params = (wqkv, wfc_r, ga, ba, w1, b1_, w2, b2_, gf, bf_, H, d_k, d_v)

    return (loc_ffn_params, mha_ffn_params)


def encoder_layer_forward(params, x, enc_qmask=None, enc_kmask=None):
    """EncoderLayer.forward: returns (output (B,L,D), enc_attn (B,H,L,L))."""
    loc_ffn_p, mha_ffn_p = params
    y = local_attn_ffn_forward(x, loc_ffn_p)                        # multi_head_loc + ffn_fast
    out, attn = mha_ffn_forward(y, mha_ffn_p,
                                qmask=enc_qmask, kmask=enc_kmask)   # MHA + ffn
    return out, attn


if __name__ == "__main__":
    # Small shapes: batch=2, seq=8, d_model=32, n_head=4, d_k=d_v=8, d_inner=64
    B, L, D = 2, 8, 32
    n_head, d_k, d_v, d_inner = 4, 8, 8, 64

    key = jax.random.PRNGKey(0)
    k_par, k_in = jax.random.split(key)
    params = init_encoder_layer_params(k_par, D, d_inner, n_head, d_k, d_v)
    x = jax.random.normal(k_in, (B, L, D), jnp.float32)

    # padding masks (1.0 => masked), as EncoderLayer would receive
    lens = jnp.array([L, L - 2], dtype=jnp.int32)
    pos = jnp.arange(L, dtype=jnp.int32)
    pad = pos[None, :] >= lens[:, None]                             # (B, L)
    enc_kmask = jnp.broadcast_to(pad[:, None, :], (B, L, L)).astype(jnp.float32)
    enc_qmask = jnp.broadcast_to(pad[:, :, None], (B, L, L)).astype(jnp.float32)

    out, attn = encoder_layer_forward(params, x,
                                      enc_qmask=enc_qmask, enc_kmask=enc_kmask)
    out_nm, attn_nm = encoder_layer_forward(params, x)   # mask-free specialization
    jax.block_until_ready((out, attn, out_nm, attn_nm))

    assert out.shape == (B, L, D) and attn.shape == (B, n_head, L, L)
    assert out_nm.shape == (B, L, D) and attn_nm.shape == (B, n_head, L, L)
    assert bool(jnp.all(jnp.isfinite(out))) and bool(jnp.all(jnp.isfinite(attn)))
    assert bool(jnp.all(jnp.isfinite(out_nm))) and bool(jnp.all(jnp.isfinite(attn_nm)))
    print("KERNEL_OK")
</pallas_src>

<mosaic_0001>
module attributes {stable_mosaic.version = 11 : i64} {
  func.func @_loc_attn_ffn_kernel(%arg0: i32, %arg1: memref<1x8x32xf32, #tpu.memory_space<vmem>>, %arg2: memref<4x16x32xbf16, #tpu.memory_space<vmem>>, %arg3: memref<4x16x1xf32, #tpu.memory_space<vmem>>, %arg4: memref<30x8xbf16, #tpu.memory_space<vmem>>, %arg5: memref<1x30x1xf32, #tpu.memory_space<vmem>>, %arg6: memref<4x15x1xf32, #tpu.memory_space<vmem>>, %arg7: memref<32x32xbf16, #tpu.memory_space<vmem>>, %arg8: memref<1x32xf32, #tpu.memory_space<vmem>>, %arg9: memref<1x32xf32, #tpu.memory_space<vmem>>, %arg10: memref<32x64xbf16, #tpu.memory_space<vmem>>, %arg11: memref<1x64xf32, #tpu.memory_space<vmem>>, %arg12: memref<64x32xbf16, #tpu.memory_space<vmem>>, %arg13: memref<1x32xf32, #tpu.memory_space<vmem>>, %arg14: memref<1x32xf32, #tpu.memory_space<vmem>>, %arg15: memref<1x32xf32, #tpu.memory_space<vmem>>, %arg16: memref<1x8x32xf32, #tpu.memory_space<vmem>>) attributes {dimension_semantics = [#tpu.dimension_semantics<parallel>], iteration_bounds = array<i64: 2>, scalar_prefetch = 0 : i64, scratch_operands = 0 : i64, tpu.core_type = #tpu.core_type<tc>, window_params = [{transform_indices = @transform_0, window_bounds = array<i64: 1, 8, 32>}, {pipeline_mode = #tpu.pipeline_mode<synchronous>, transform_indices = @transform_1, window_bounds = array<i64: 4, 16, 32>}, {pipeline_mode = #tpu.pipeline_mode<synchronous>, transform_indices = @transform_2, window_bounds = array<i64: 4, 16, 1>}, {pipeline_mode = #tpu.pipeline_mode<synchronous>, transform_indices = @transform_3, window_bounds = array<i64: 30, 8>}, {pipeline_mode = #tpu.pipeline_mode<synchronous>, transform_indices = @transform_4, window_bounds = array<i64: 1, 30, 1>}, {pipeline_mode = #tpu.pipeline_mode<synchronous>, transform_indices = @transform_5, window_bounds = array<i64: 4, 15, 1>}, {pipeline_mode = #tpu.pipeline_mode<synchronous>, transform_indices = @transform_6, window_bounds = array<i64: 32, 32>}, {pipeline_mode = #tpu.pipeline_mode<synchronous>, transform_indices = @transform_7, window_bounds = array<i64: 1, 32>}, {pipeline_mode = #tpu.pipeline_mode<synchronous>, transform_indices = @transform_8, window_bounds = array<i64: 1, 32>}, {pipeline_mode = #tpu.pipeline_mode<synchronous>, transform_indices = @transform_9, window_bounds = array<i64: 32, 64>}, {pipeline_mode = #tpu.pipeline_mode<synchronous>, transform_indices = @transform_10, window_bounds = array<i64: 1, 64>}, {pipeline_mode = #tpu.pipeline_mode<synchronous>, transform_indices = @transform_11, window_bounds = array<i64: 64, 32>}, {pipeline_mode = #tpu.pipeline_mode<synchronous>, transform_indices = @transform_12, window_bounds = array<i64: 1, 32>}, {pipeline_mode = #tpu.pipeline_mode<synchronous>, transform_indices = @transform_13, window_bounds = array<i64: 1, 32>}, {pipeline_mode = #tpu.pipeline_mode<synchronous>, transform_indices = @transform_14, window_bounds = array<i64: 1, 32>}, {transform_indices = @transform_15, window_bounds = array<i64: 1, 8, 32>}]} {
    %c0 = arith.constant 0 : index
    %c0_0 = arith.constant 0 : index
    %c0_1 = arith.constant 0 : index
    %0 = vector.load %arg1[%c0, %c0_0, %c0_1] : memref<1x8x32xf32, #tpu.memory_space<vmem>>, vector<1x8x32xf32>
    %1 = vector.shape_cast %0 : vector<1x8x32xf32> to vector<8x32xf32>
    %2 = arith.truncf %1 : vector<8x32xf32> to vector<8x32xbf16>
    %3 = vector.shape_cast %2 : vector<8x32xbf16> to vector<1x8x32xbf16>
    %4 = vector.shape_cast %3 : vector<1x8x32xbf16> to vector<1x8x32xbf16>
    %5 = vector.broadcast %4 : vector<1x8x32xbf16> to vector<4x8x32xbf16>
    %c0_2 = arith.constant 0 : index
    %c0_3 = arith.constant 0 : index
    %c0_4 = arith.constant 0 : index
    %6 = vector.load %arg2[%c0_2, %c0_3, %c0_4] : memref<4x16x32xbf16, #tpu.memory_space<vmem>>, vector<4x16x32xbf16>
    "tpu.trace_start"() <{level = 10 : i32, message = "hnd,hld->hnl"}> : () -> ()
    %cst = arith.constant dense<0.000000e+00> : vector<4x16x8xf32>
    %7 = tpu.matmul %6, %5, %cst {dimension_numbers = #tpu.dot_dimension_numbers<[2], [2], [1], [1], [0, 0, 0, 1, 1, 1], [0], [0]>} : vector<4x16x32xbf16>, vector<4x8x32xbf16>, vector<4x16x8xf32> -> vector<4x16x8xf32>
    "tpu.trace_stop"() : () -> ()
    %c0_5 = arith.constant 0 : index
    %c0_6 = arith.constant 0 : index
    %c0_7 = arith.constant 0 : index
    %8 = vector.load %arg3[%c0_5, %c0_6, %c0_7] : memref<4x16x1xf32, #tpu.memory_space<vmem>>, vector<4x16x1xf32>
    %9 = vector.broadcast %8 : vector<4x16x1xf32> to vector<4x16x8xf32>
    %10 = arith.addf %7, %9 : vector<4x16x8xf32>
    %11 = vector.extract_strided_slice %10 {offsets = [0, 0, 0], sizes = [4, 8, 8], strides = [1, 1, 1]} : vector<4x16x8xf32> to vector<4x8x8xf32>
    %12 = vector.extract_strided_slice %10 {offsets = [0, 8, 0], sizes = [4, 8, 8], strides = [1, 1, 1]} : vector<4x16x8xf32> to vector<4x8x8xf32>
    %cst_8 = arith.constant 0.000000e+00 : f32
    %13 = vector.broadcast %cst_8 : f32 to vector<4x8x8xf32>
    %14 = arith.subf %13, %12 : vector<4x8x8xf32>
    %15 = math.exp %14 : vector<4x8x8xf32>
    %cst_9 = arith.constant 1.000000e+00 : f32
    %16 = vector.broadcast %cst_9 : f32 to vector<4x8x8xf32>
    %17 = arith.addf %16, %15 : vector<4x8x8xf32>
    %18 = tpu.reciprocal %17 {approx = true} : vector<4x8x8xf32> -> vector<4x8x8xf32>
    %19 = arith.mulf %11, %18 : vector<4x8x8xf32>
    %20 = arith.truncf %19 : vector<4x8x8xf32> to vector<4x8x8xbf16>
    %c0_10 = arith.constant 0 : index
    %c0_11 = arith.constant 0 : index
    %21 = vector.load %arg4[%c0_10, %c0_11] : memref<30x8xbf16, #tpu.memory_space<vmem>>, vector<30x8xbf16>
    %22 = vector.shape_cast %21 : vector<30x8xbf16> to vector<1x30x8xbf16>
    %23 = vector.shape_cast %22 : vector<1x30x8xbf16> to vector<1x30x8xbf16>
    %24 = vector.broadcast %23 : vector<1x30x8xbf16> to vector<4x30x8xbf16>
    "tpu.trace_start"() <{level = 10 : i32, message = "hkc,hcl->hkl"}> : () -> ()
    %cst_12 = arith.constant dense<0.000000e+00> : vector<4x30x8xf32>
    %25 = tpu.matmul %24, %20, %cst_12 {dimension_numbers = #tpu.dot_dimension_numbers<[2], [1], [1], [2], [0, 0, 0, 1, 1, 2], [0], [0]>} : vector<4x30x8xbf16>, vector<4x8x8xbf16>, vector<4x30x8xf32> -> vector<4x30x8xf32>
    "tpu.trace_stop"() : () -> ()
    %c0_13 = arith.constant 0 : index
    %c0_14 = arith.constant 0 : index
    %c0_15 = arith.constant 0 : index
    %26 = vector.load %arg5[%c0_13, %c0_14, %c0_15] : memref<1x30x1xf32, #tpu.memory_space<vmem>>, vector<1x30x1xf32>
    %27 = vector.broadcast %26 : vector<1x30x1xf32> to vector<4x30x8xf32>
    %28 = arith.addf %25, %27 : vector<4x30x8xf32>
    %29 = vector.extract_strided_slice %28 {offsets = [0, 15, 0], sizes = [4, 15, 8], strides = [1, 1, 1]} : vector<4x30x8xf32> to vector<4x15x8xf32>
    %cst_16 = arith.constant 0.000000e+00 : f32
    %30 = vector.broadcast %cst_16 : f32 to vector<4x15x8xf32>
    %31 = arith.subf %30, %29 : vector<4x15x8xf32>
    %32 = math.exp %31 : vector<4x15x8xf32>
    %cst_17 = arith.constant 1.000000e+00 : f32
    %33 = vector.broadcast %cst_17 : f32 to vector<4x15x8xf32>
    %34 = arith.addf %33, %32 : vector<4x15x8xf32>
    %35 = tpu.reciprocal %34 {approx = true} : vector<4x15x8xf32> -> vector<4x15x8xf32>
    %36 = vector.extract_strided_slice %28 {offsets = [0, 0, 0], sizes = [4, 15, 8], strides = [1, 1, 1]} : vector<4x30x8xf32> to vector<4x15x8xf32>
    %37 = arith.mulf %35, %36 : vector<4x15x8xf32>
    %c0_18 = arith.constant 0 : index
    %c0_19 = arith.constant 0 : index
    %c0_20 = arith.constant 0 : index
    %38 = vector.load %arg6[%c0_18, %c0_19, %c0_20] : memref<4x15x1xf32, #tpu.memory_space<vmem>>, vector<4x15x1xf32>
    %39 = vector.broadcast %38 : vector<4x15x1xf32> to vector<4x15x8xf32>
    %40 = arith.addf %37, %39 : vector<4x15x8xf32>
    %cst_21 = arith.constant dense<0xFF800000> : vector<4x8xf32>
    %41 = vector.multi_reduction <maximumf>, %40, %cst_21 [1] : vector<4x15x8xf32> to vector<4x8xf32>
    %42 = vector.shape_cast %41 : vector<4x8xf32> to vector<4x1x8xf32>
    %cst_22 = arith.constant -1.000000e+04 : f32
    %43 = vector.broadcast %cst_22 : f32 to vector<4x1x8xf32>
    %44 = arith.maximumf %42, %43 : vector<4x1x8xf32>
    %45 = vector.broadcast %44 : vector<4x1x8xf32> to vector<4x15x8xf32>
    %46 = arith.subf %40, %45 : vector<4x15x8xf32>
    %47 = math.exp %46 : vector<4x15x8xf32>
    %cst_23 = arith.constant -1.000000e+04 : f32
    %48 = vector.broadcast %cst_23 : f32 to vector<4x1x8xf32>
    %49 = arith.subf %48, %44 : vector<4x1x8xf32>
    %50 = math.exp %49 : vector<4x1x8xf32>
    %cst_24 = arith.constant dense<0.000000e+00> : vector<4x8xf32>
    %51 = vector.multi_reduction <add>, %47, %cst_24 [1] : vector<4x15x8xf32> to vector<4x8xf32>
    %52 = vector.shape_cast %51 : vector<4x8xf32> to vector<4x1x8xf32>
    %cst_25 = arith.constant 7.000000e+00 : f32
    %53 = vector.broadcast %cst_25 : f32 to vector<4x1x8xf32>
    %54 = arith.mulf %53, %50 : vector<4x1x8xf32>
    %55 = arith.addf %52, %54 : vector<4x1x8xf32>
    %56 = tpu.reciprocal %55 {approx = true} : vector<4x1x8xf32> -> vector<4x1x8xf32>
    %cst_26 = arith.constant 0.000000e+00 : f32
    %57 = vector.broadcast %cst_26 : f32 to vector<4x8x7xf32>
    %cst_27 = arith.constant 0.000000e+00 : f32
    %58 = vector.broadcast %cst_27 : f32 to vector<4x8x7xf32>
    %59 = tpu.concatenate %57, %19, %58 in 2 : vector<4x8x7xf32>, vector<4x8x8xf32>, vector<4x8x7xf32> -> vector<4x8x22xf32>
    %60 = vector.extract_strided_slice %47 {offsets = [0, 0, 0], sizes = [4, 1, 8], strides = [1, 1, 1]} : vector<4x15x8xf32> to vector<4x1x8xf32>
    %61 = vector.extract_strided_slice %59 {offsets = [0, 0, 0], sizes = [4, 8, 8], strides = [1, 1, 1]} : vector<4x8x22xf32> to vector<4x8x8xf32>
    %62 = vector.broadcast %60 : vector<4x1x8xf32> to vector<4x8x8xf32>
    %63 = arith.mulf %62, %61 : vector<4x8x8xf32>
    %64 = vector.extract_strided_slice %47 {offsets = [0, 1, 0], sizes = [4, 1, 8], strides = [1, 1, 1]} : vector<4x15x8xf32> to vector<4x1x8xf32>
    %65 = vector.extract_strided_slice %59 {offsets = [0, 0, 1], sizes = [4, 8, 8], strides = [1, 1, 1]} : vector<4x8x22xf32> to vector<4x8x8xf32>
    %66 = vector.broadcast %64 : vector<4x1x8xf32> to vector<4x8x8xf32>
    %67 = arith.mulf %66, %65 : vector<4x8x8xf32>
    %68 = arith.addf %63, %67 : vector<4x8x8xf32>
    %69 = vector.extract_strided_slice %47 {offsets = [0, 2, 0], sizes = [4, 1, 8], strides = [1, 1, 1]} : vector<4x15x8xf32> to vector<4x1x8xf32>
    %70 = vector.extract_strided_slice %59 {offsets = [0, 0, 2], sizes = [4, 8, 8], strides = [1, 1, 1]} : vector<4x8x22xf32> to vector<4x8x8xf32>
    %71 = vector.broadcast %69 : vector<4x1x8xf32> to vector<4x8x8xf32>
    %72 = arith.mulf %71, %70 : vector<4x8x8xf32>
    %73 = arith.addf %68, %72 : vector<4x8x8xf32>
    %74 = vector.extract_strided_slice %47 {offsets = [0, 3, 0], sizes = [4, 1, 8], strides = [1, 1, 1]} : vector<4x15x8xf32> to vector<4x1x8xf32>
    %75 = vector.extract_strided_slice %59 {offsets = [0, 0, 3], sizes = [4, 8, 8], strides = [1, 1, 1]} : vector<4x8x22xf32> to vector<4x8x8xf32>
    %76 = vector.broadcast %74 : vector<4x1x8xf32> to vector<4x8x8xf32>
    %77 = arith.mulf %76, %75 : vector<4x8x8xf32>
    %78 = arith.addf %73, %77 : vector<4x8x8xf32>
    %79 = vector.extract_strided_slice %47 {offsets = [0, 4, 0], sizes = [4, 1, 8], strides = [1, 1, 1]} : vector<4x15x8xf32> to vector<4x1x8xf32>
    %80 = vector.extract_strided_slice %59 {offsets = [0, 0, 4], sizes = [4, 8, 8], strides = [1, 1, 1]} : vector<4x8x22xf32> to vector<4x8x8xf32>
    %81 = vector.broadcast %79 : vector<4x1x8xf32> to vector<4x8x8xf32>
    %82 = arith.mulf %81, %80 : vector<4x8x8xf32>
    %83 = arith.addf %78, %82 : vector<4x8x8xf32>
    %84 = vector.extract_strided_slice %47 {offsets = [0, 5, 0], sizes = [4, 1, 8], strides = [1, 1, 1]} : vector<4x15x8xf32> to vector<4x1x8xf32>
    %85 = vector.extract_strided_slice %59 {offsets = [0, 0, 5], sizes = [4, 8, 8], strides = [1, 1, 1]} : vector<4x8x22xf32> to vector<4x8x8xf32>
    %86 = vector.broadcast %84 : vector<4x1x8xf32> to vector<4x8x8xf32>
    %87 = arith.mulf %86, %85 : vector<4x8x8xf32>
    %88 = arith.addf %83, %87 : vector<4x8x8xf32>
    %89 = vector.extract_strided_slice %47 {offsets = [0, 6, 0], sizes = [4, 1, 8], strides = [1, 1, 1]} : vector<4x15x8xf32> to vector<4x1x8xf32>
    %90 = vector.extract_strided_slice %59 {offsets = [0, 0, 6], sizes = [4, 8, 8], strides = [1, 1, 1]} : vector<4x8x22xf32> to vector<4x8x8xf32>
    %91 = vector.broadcast %89 : vector<4x1x8xf32> to vector<4x8x8xf32>
    %92 = arith.mulf %91, %90 : vector<4x8x8xf32>
    %93 = arith.addf %88, %92 : vector<4x8x8xf32>
    %94 = vector.extract_strided_slice %47 {offsets = [0, 7, 0], sizes = [4, 1, 8], strides = [1, 1, 1]} : vector<4x15x8xf32> to vector<4x1x8xf32>
    %95 = vector.extract_strided_slice %59 {offsets = [0, 0, 7], sizes = [4, 8, 8], strides = [1, 1, 1]} : vector<4x8x22xf32> to vector<4x8x8xf32>
    %96 = vector.broadcast %94 : vector<4x1x8xf32> to vector<4x8x8xf32>
    %97 = arith.mulf %96, %95 : vector<4x8x8xf32>
    %98 = arith.addf %93, %97 : vector<4x8x8xf32>
    %99 = vector.extract_strided_slice %47 {offsets = [0, 8, 0], sizes = [4, 1, 8], strides = [1, 1, 1]} : vector<4x15x8xf32> to vector<4x1x8xf32>
    %100 = vector.extract_strided_slice %59 {offsets = [0, 0, 8], sizes = [4, 8, 8], strides = [1, 1, 1]} : vector<4x8x22xf32> to vector<4x8x8xf32>
    %101 = vector.broadcast %99 : vector<4x1x8xf32> to vector<4x8x8xf32>
    %102 = arith.mulf %101, %100 : vector<4x8x8xf32>
    %103 = arith.addf %98, %102 : vector<4x8x8xf32>
    %104 = vector.extract_strided_slice %47 {offsets = [0, 9, 0], sizes = [4, 1, 8], strides = [1, 1, 1]} : vector<4x15x8xf32> to vector<4x1x8xf32>
    %105 = vector.extract_strided_slice %59 {offsets = [0, 0, 9], sizes = [4, 8, 8], strides = [1, 1, 1]} : vector<4x8x22xf32> to vector<4x8x8xf32>
    %106 = vector.broadcast %104 : vector<4x1x8xf32> to vector<4x8x8xf32>
    %107 = arith.mulf %106, %105 : vector<4x8x8xf32>
    %108 = arith.addf %103, %107 : vector<4x8x8xf32>
    %109 = vector.extract_strided_slice %47 {offsets = [0, 10, 0], sizes = [4, 1, 8], strides = [1, 1, 1]} : vector<4x15x8xf32> to vector<4x1x8xf32>
    %110 = vector.extract_strided_slice %59 {offsets = [0, 0, 10], sizes = [4, 8, 8], strides = [1, 1, 1]} : vector<4x8x22xf32> to vector<4x8x8xf32>
    %111 = vector.broadcast %109 : vector<4x1x8xf32> to vector<4x8x8xf32>
    %112 = arith.mulf %111, %110 : vector<4x8x8xf32>
    %113 = arith.addf %108, %112 : vector<4x8x8xf32>
    %114 = vector.extract_strided_slice %47 {offsets = [0, 11, 0], sizes = [4, 1, 8], strides = [1, 1, 1]} : vector<4x15x8xf32> to vector<4x1x8xf32>
    %115 = vector.extract_strided_slice %59 {offsets = [0, 0, 11], sizes = [4, 8, 8], strides = [1, 1, 1]} : vector<4x8x22xf32> to vector<4x8x8xf32>
    %116 = vector.broadcast %114 : vector<4x1x8xf32> to vector<4x8x8xf32>
    %117 = arith.mulf %116, %115 : vector<4x8x8xf32>
    %118 = arith.addf %113, %117 : vector<4x8x8xf32>
    %119 = vector.extract_strided_slice %47 {offsets = [0, 12, 0], sizes = [4, 1, 8], strides = [1, 1, 1]} : vector<4x15x8xf32> to vector<4x1x8xf32>
    %120 = vector.extract_strided_slice %59 {offsets = [0, 0, 12], sizes = [4, 8, 8], strides = [1, 1, 1]} : vector<4x8x22xf32> to vector<4x8x8xf32>
    %121 = vector.broadcast %119 : vector<4x1x8xf32> to vector<4x8x8xf32>
    %122 = arith.mulf %121, %120 : vector<4x8x8xf32>
    %123 = arith.addf %118, %122 : vector<4x8x8xf32>
    %124 = vector.extract_strided_slice %47 {offsets = [0, 13, 0], sizes = [4, 1, 8], strides = [1, 1, 1]} : vector<4x15x8xf32> to vector<4x1x8xf32>
    %125 = vector.extract_strided_slice %59 {offsets = [0, 0, 13], sizes = [4, 8, 8], strides = [1, 1, 1]} : vector<4x8x22xf32> to vector<4x8x8xf32>
    %126 = vector.broadcast %124 : vector<4x1x8xf32> to vector<4x8x8xf32>
    %127 = arith.mulf %126, %125 : vector<4x8x8xf32>
    %128 = arith.addf %123, %127 : vector<4x8x8xf32>
    %129 = vector.extract_strided_slice %47 {offsets = [0, 14, 0], sizes = [4, 1, 8], strides = [1, 1, 1]} : vector<4x15x8xf32> to vector<4x1x8xf32>
    %130 = vector.extract_strided_slice %59 {offsets = [0, 0, 14], sizes = [4, 8, 8], strides = [1, 1, 1]} : vector<4x8x22xf32> to vector<4x8x8xf32>
    %131 = vector.broadcast %129 : vector<4x1x8xf32> to vector<4x8x8xf32>
    %132 = arith.mulf %131, %130 : vector<4x8x8xf32>
    %133 = arith.addf %128, %132 : vector<4x8x8xf32>
    %134 = vector.broadcast %56 : vector<4x1x8xf32> to vector<4x8x8xf32>
    %135 = arith.mulf %133, %134 : vector<4x8x8xf32>
    %136 = vector.shape_cast %135 : vector<4x8x8xf32> to vector<32x8xf32>
    %137 = tpu.transpose %136, [1, 0] : vector<32x8xf32> -> vector<8x32xf32>
    %138 = arith.truncf %137 : vector<8x32xf32> to vector<8x32xbf16>
    %c0_28 = arith.constant 0 : index
    %c0_29 = arith.constant 0 : index
    %139 = vector.load %arg7[%c0_28, %c0_29] : memref<32x32xbf16, #tpu.memory_space<vmem>>, vector<32x32xbf16>
    %cst_30 = arith.constant dense<0.000000e+00> : vector<8x32xf32>
    %140 = tpu.matmul %138, %139, %cst_30 {dimension_numbers = #tpu.dot_dimension_numbers<[1], [0], [0], [1], [0, 0, 1, 1], [], []>} : vector<8x32xbf16>, vector<32x32xbf16>, vector<8x32xf32> -> vector<8x32xf32>
    %141 = arith.addf %140, %1 : vector<8x32xf32>
    %c0_31 = arith.constant 0 : index
    %c0_32 = arith.constant 0 : index
    %142 = vector.load %arg8[%c0_31, %c0_32] : memref<1x32xf32, #tpu.memory_space<vmem>>, vector<1x32xf32>
    %c0_33 = arith.constant 0 : index
    %c0_34 = arith.constant 0 : index
    %143 = vector.load %arg9[%c0_33, %c0_34] : memref<1x32xf32, #tpu.memory_space<vmem>>, vector<1x32xf32>
    %cst_35 = arith.constant dense<0.000000e+00> : vector<8xf32>
    %144 = vector.multi_reduction <add>, %141, %cst_35 [1] : vector<8x32xf32> to vector<8xf32>
    %145 = vector.shape_cast %144 : vector<8xf32> to vector<8x1xf32>
    %cst_36 = arith.constant 3.200000e+01 : f32
    %146 = vector.broadcast %cst_36 : f32 to vector<8x1xf32>
    %147 = arith.divf %145, %146 : vector<8x1xf32>
    %148 = vector.broadcast %147 : vector<8x1xf32> to vector<8x32xf32>
    %149 = arith.subf %141, %148 : vector<8x32xf32>
    %150 = arith.mulf %149, %149 : vector<8x32xf32>
    %cst_37 = arith.constant dense<0.000000e+00> : vector<8xf32>
    %151 = vector.multi_reduction <add>, %150, %cst_37 [1] : vector<8x32xf32> to vector<8xf32>
    %152 = vector.shape_cast %151 : vector<8xf32> to vector<8x1xf32>
    %cst_38 = arith.constant 3.200000e+01 : f32
    %153 = vector.broadcast %cst_38 : f32 to vector<8x1xf32>
    %154 = arith.divf %152, %153 : vector<8x1xf32>
    %155 = vector.broadcast %147 : vector<8x1xf32> to vector<8x32xf32>
    %156 = arith.subf %141, %155 : vector<8x32xf32>
    %cst_39 = arith.constant 9.99999997E-7 : f32
    %157 = vector.broadcast %cst_39 : f32 to vector<8x1xf32>
    %158 = arith.addf %154, %157 : vector<8x1xf32>
    %159 = math.rsqrt %158 : vector<8x1xf32>
    %160 = vector.broadcast %159 : vector<8x1xf32> to vector<8x32xf32>
    %161 = arith.mulf %156, %160 : vector<8x32xf32>
    %162 = vector.broadcast %142 : vector<1x32xf32> to vector<8x32xf32>
    %163 = arith.mulf %161, %162 : vector<8x32xf32>
    %164 = vector.broadcast %143 : vector<1x32xf32> to vector<8x32xf32>
    %165 = arith.addf %163, %164 : vector<8x32xf32>
    %166 = arith.truncf %165 : vector<8x32xf32> to vector<8x32xbf16>
    %c0_40 = arith.constant 0 : index
    %c0_41 = arith.constant 0 : index
    %167 = vector.load %arg10[%c0_40, %c0_41] : memref<32x64xbf16, #tpu.memory_space<vmem>>, vector<32x64xbf16>
    %cst_42 = arith.constant dense<0.000000e+00> : vector<8x64xf32>
    %168 = tpu.matmul %166, %167, %cst_42 {dimension_numbers = #tpu.dot_dimension_numbers<[1], [0], [0], [1], [0, 0, 1, 1], [], []>} : vector<8x32xbf16>, vector<32x64xbf16>, vector<8x64xf32> -> vector<8x64xf32>
    %c0_43 = arith.constant 0 : index
    %c0_44 = arith.constant 0 : index
    %169 = vector.load %arg11[%c0_43, %c0_44] : memref<1x64xf32, #tpu.memory_space<vmem>>, vector<1x64xf32>
    %170 = vector.broadcast %169 : vector<1x64xf32> to vector<8x64xf32>
    %171 = arith.addf %168, %170 : vector<8x64xf32>
    %cst_45 = arith.constant 0.000000e+00 : f32
    %172 = vector.broadcast %cst_45 : f32 to vector<8x64xf32>
    %173 = arith.maximumf %171, %172 : vector<8x64xf32>
    %174 = arith.truncf %173 : vector<8x64xf32> to vector<8x64xbf16>
    %c0_46 = arith.constant 0 : index
    %c0_47 = arith.constant 0 : index
    %175 = vector.load %arg12[%c0_46, %c0_47] : memref<64x32xbf16, #tpu.memory_space<vmem>>, vector<64x32xbf16>
    %cst_48 = arith.constant dense<0.000000e+00> : vector<8x32xf32>
    %176 = tpu.matmul %174, %175, %cst_48 {dimension_numbers = #tpu.dot_dimension_numbers<[1], [0], [0], [1], [0, 0, 1, 1], [], []>} : vector<8x64xbf16>, vector<64x32xbf16>, vector<8x32xf32> -> vector<8x32xf32>
    %c0_49 = arith.constant 0 : index
    %c0_50 = arith.constant 0 : index
    %177 = vector.load %arg13[%c0_49, %c0_50] : memref<1x32xf32, #tpu.memory_space<vmem>>, vector<1x32xf32>
    %178 = vector.broadcast %177 : vector<1x32xf32> to vector<8x32xf32>
    %179 = arith.addf %176, %178 : vector<8x32xf32>
    %180 = arith.addf %179, %165 : vector<8x32xf32>
    %c0_51 = arith.constant 0 : index
    %c0_52 = arith.constant 0 : index
    %181 = vector.load %arg14[%c0_51, %c0_52] : memref<1x32xf32, #tpu.memory_space<vmem>>, vector<1x32xf32>
    %c0_53 = arith.constant 0 : index
    %c0_54 = arith.constant 0 : index
    %182 = vector.load %arg15[%c0_53, %c0_54] : memref<1x32xf32, #tpu.memory_space<vmem>>, vector<1x32xf32>
    %cst_55 = arith.constant dense<0.000000e+00> : vector<8xf32>
    %183 = vector.multi_reduction <add>, %180, %cst_55 [1] : vector<8x32xf32> to vector<8xf32>
    %184 = vector.shape_cast %183 : vector<8xf32> to vector<8x1xf32>
    %cst_56 = arith.constant 3.200000e+01 : f32
    %185 = vector.broadcast %cst_56 : f32 to vector<8x1xf32>
    %186 = arith.divf %184, %185 : vector<8x1xf32>
    %187 = vector.broadcast %186 : vector<8x1xf32> to vector<8x32xf32>
    %188 = arith.subf %180, %187 : vector<8x32xf32>
    %189 = arith.mulf %188, %188 : vector<8x32xf32>
    %cst_57 = arith.constant dense<0.000000e+00> : vector<8xf32>
    %190 = vector.multi_reduction <add>, %189, %cst_57 [1] : vector<8x32xf32> to vector<8xf32>
    %191 = vector.shape_cast %190 : vector<8xf32> to vector<8x1xf32>
    %cst_58 = arith.constant 3.200000e+01 : f32
    %192 = vector.broadcast %cst_58 : f32 to vector<8x1xf32>
    %193 = arith.divf %191, %192 : vector<8x1xf32>
    %194 = vector.broadcast %186 : vector<8x1xf32> to vector<8x32xf32>
    %195 = arith.subf %180, %194 : vector<8x32xf32>
    %cst_59 = arith.constant 9.99999997E-7 : f32
    %196 = vector.broadcast %cst_59 : f32 to vector<8x1xf32>
    %197 = arith.addf %193, %196 : vector<8x1xf32>
    %198 = math.rsqrt %197 : vector<8x1xf32>
    %199 = vector.broadcast %198 : vector<8x1xf32> to vector<8x32xf32>
    %200 = arith.mulf %195, %199 : vector<8x32xf32>
    %201 = vector.broadcast %181 : vector<1x32xf32> to vector<8x32xf32>
    %202 = arith.mulf %200, %201 : vector<8x32xf32>
    %203 = vector.broadcast %182 : vector<1x32xf32> to vector<8x32xf32>
    %204 = arith.addf %202, %203 : vector<8x32xf32>
    %c0_60 = arith.constant 0 : index
    %c0_61 = arith.constant 0 : index
    %c0_62 = arith.constant 0 : index
    %205 = vector.load %arg16[%c0_60, %c0_61, %c0_62] : memref<1x8x32xf32, #tpu.memory_space<vmem>>, vector<1x8x32xf32>
    %206 = vector.shape_cast %205 : vector<1x8x32xf32> to vector<8x32xf32>
    %207 = vector.shape_cast %204 : vector<8x32xf32> to vector<1x8x32xf32>
    tpu.vector_store %arg16[%c0_60, %c0_61, %c0_62], %207 {strides = array<i32>} : memref<1x8x32xf32, #tpu.memory_space<vmem>>, vector<1x8x32xf32>,
    return
  }
  func.func @transform_0(%arg0: i32) -> (i32, i32, i32) {
    %c0_i32 = arith.constant 0 : i32
    %c0_i32_0 = arith.constant 0 : i32
    %c0_i32_1 = arith.constant 0 : i32
    return %arg0, %c0_i32, %c0_i32_0 : i32, i32, i32
  }
  func.func @transform_1(%arg0: i32) -> (i32, i32, i32) {
    %c0_i32 = arith.constant 0 : i32
    %c0_i32_0 = arith.constant 0 : i32
    %c0_i32_1 = arith.constant 0 : i32
    %c0_i32_2 = arith.constant 0 : i32
    return %c0_i32, %c0_i32_0, %c0_i32_1 : i32, i32, i32
  }
  func.func @transform_2(%arg0: i32) -> (i32, i32, i32) {
    %c0_i32 = arith.constant 0 : i32
    %c0_i32_0 = arith.constant 0 : i32
    %c0_i32_1 = arith.constant 0 : i32
    %c0_i32_2 = arith.constant 0 : i32
    return %c0_i32, %c0_i32_0, %c0_i32_1 : i32, i32, i32
  }
  func.func @transform_3(%arg0: i32) -> (i32, i32) {
    %c0_i32 = arith.constant 0 : i32
    %c0_i32_0 = arith.constant 0 : i32
    %c0_i32_1 = arith.constant 0 : i32
    return %c0_i32, %c0_i32_0 : i32, i32
  }
  func.func @transform_4(%arg0: i32) -> (i32, i32, i32) {
    %c0_i32 = arith.constant 0 : i32
    %c0_i32_0 = arith.constant 0 : i32
    %c0_i32_1 = arith.constant 0 : i32
    %c0_i32_2 = arith.constant 0 : i32
    return %c0_i32, %c0_i32_0, %c0_i32_1 : i32, i32, i32
  }
  func.func @transform_5(%arg0: i32) -> (i32, i32, i32) {
    %c0_i32 = arith.constant 0 : i32
    %c0_i32_0 = arith.constant 0 : i32
    %c0_i32_1 = arith.constant 0 : i32
    %c0_i32_2 = arith.constant 0 : i32
    return %c0_i32, %c0_i32_0, %c0_i32_1 : i32, i32, i32
  }
  func.func @transform_6(%arg0: i32) -> (i32, i32) {
    %c0_i32 = arith.constant 0 : i32
    %c0_i32_0 = arith.constant 0 : i32
    %c0_i32_1 = arith.constant 0 : i32
    return %c0_i32, %c0_i32_0 : i32, i32
  }
  func.func @transform_7(%arg0: i32) -> (i32, i32) {
    %c0_i32 = arith.constant 0 : i32
    %c0_i32_0 = arith.constant 0 : i32
    %c0_i32_1 = arith.constant 0 : i32
    return %c0_i32, %c0_i32_0 : i32, i32
  }
  func.func @transform_8(%arg0: i32) -> (i32, i32) {
    %c0_i32 = arith.constant 0 : i32
    %c0_i32_0 = arith.constant 0 : i32
    %c0_i32_1 = arith.constant 0 : i32
    return %c0_i32, %c0_i32_0 : i32, i32
  }
  func.func @transform_9(%arg0: i32) -> (i32, i32) {
    %c0_i32 = arith.constant 0 : i32
    %c0_i32_0 = arith.constant 0 : i32
    %c0_i32_1 = arith.constant 0 : i32
    return %c0_i32, %c0_i32_0 : i32, i32
  }
  func.func @transform_10(%arg0: i32) -> (i32, i32) {
    %c0_i32 = arith.constant 0 : i32
    %c0_i32_0 = arith.constant 0 : i32
    %c0_i32_1 = arith.constant 0 : i32
    return %c0_i32, %c0_i32_0 : i32, i32
  }
  func.func @transform_11(%arg0: i32) -> (i32, i32) {
    %c0_i32 = arith.constant 0 : i32
    %c0_i32_0 = arith.constant 0 : i32
    %c0_i32_1 = arith.constant 0 : i32
    return %c0_i32, %c0_i32_0 : i32, i32
  }
  func.func @transform_12(%arg0: i32) -> (i32, i32) {
    %c0_i32 = arith.constant 0 : i32
    %c0_i32_0 = arith.constant 0 : i32
    %c0_i32_1 = arith.constant 0 : i32
    return %c0_i32, %c0_i32_0 : i32, i32
  }
  func.func @transform_13(%arg0: i32) -> (i32, i32) {
    %c0_i32 = arith.constant 0 : i32
    %c0_i32_0 = arith.constant 0 : i32
    %c0_i32_1 = arith.constant 0 : i32
    return %c0_i32, %c0_i32_0 : i32, i32
  }
  func.func @transform_14(%arg0: i32) -> (i32, i32) {
    %c0_i32 = arith.constant 0 : i32
    %c0_i32_0 = arith.constant 0 : i32
    %c0_i32_1 = arith.constant 0 : i32
    return %c0_i32, %c0_i32_0 : i32, i32
  }
  func.func @transform_15(%arg0: i32) -> (i32, i32, i32) {
    %c0_i32 = arith.constant 0 : i32
    %c0_i32_0 = arith.constant 0 : i32
    %c0_i32_1 = arith.constant 0 : i32
    return %arg0, %c0_i32, %c0_i32_0 : i32, i32, i32
  }
}

</mosaic_0001>

<bundles_post_ra>
// kernel: tpu_custom_call.1
= control target key start
LH: loop header
LB: loop body
LE: loop exit
PB: predicated region body
PF: predicated region fallthrough
CT: control target
= control target key end

     0   :  { %s3877_s0 = inlined_call_operand.vmem [shape: f32[2,8,32], index: 0, kind: input, shape index: {}]   ;;  %s3878_s1 = inlined_call_operand.vmem [shape: bf16[4,16,32], index: 1, kind: input, shape index: {}]   ;;  %s3879_s2 = inlined_call_operand.vmem [shape: f32[4,16,1], index: 2, kind: input, shape index: {}]   ;;  %s3880_s3 = inlined_call_operand.vmem [shape: bf16[30,8], index: 3, kind: input, shape index: {}]   ;;  %s3881_s4 = inlined_call_operand.vmem [shape: f32[1,30,1], index: 4, kind: input, shape index: {}]   ;;  %s3882_s5 = inlined_call_operand.vmem [shape: f32[4,15,1], index: 5, kind: input, shape index: {}]   ;;  %s3883_s6 = inlined_call_operand.vmem [shape: bf16[32,32], index: 6, kind: input, shape index: {}]   ;;  %s3884_s7 = inlined_call_operand.vmem [shape: f32[1,32], index: 7, kind: input, shape index: {}]   ;;  %s3885_s8 = inlined_call_operand.vmem [shape: f32[1,32], index: 8, kind: input, shape index: {}]   ;;  %s3886_s9 = inlined_call_operand.vmem [shape: bf16[32,64], index: 9, kind: input, shape index: {}]   ;;  %s3887_s10 = inlined_call_operand.vmem [shape: f32[1,64], index: 10, kind: input, shape index: {}]   ;;  %s3888_s11 = inlined_call_operand.vmem [shape: bf16[64,32], index: 11, kind: input, shape index: {}]   ;;  %s3889_s12 = inlined_call_operand.vmem [shape: f32[1,32], index: 12, kind: input, shape index: {}]   ;;  %s3890_s13 = inlined_call_operand.vmem [shape: f32[1,32], index: 13, kind: input, shape index: {}]   ;;  %s3891_s14 = inlined_call_operand.vmem [shape: f32[1,32], index: 14, kind: input, shape index: {}]   ;;  %s3892_s15 = inlined_call_operand.hbm [shape: f32[2,8,32], index: 15, kind: output, shape index: {}]  }
   0x1   :  { %3914 = sst [smem:[#allocation20_spill]] %s3877_s0 }
   0x2   :  { %3915 = sst [smem:[#allocation21_spill]] %s3878_s1 }
   0x3   :  { %20 = vsyncpa [#allocation3], 0 }
   0x4   :  { %22 = vsyncpa [#allocation3 + $0x1], 0  ;;  %s2837_s18 = smov 0   ;;  %s2839_s19 = smov 0  }
   0x5   :  { %s2841_s20 = smov 0   ;;  %s2843_s21 = smov 0  }
   0x6 LB: > { %3916 = sst [smem:[#allocation5_spill]] %s2732_s20  ;;  %s2858_s22 = sadd.s32 4294967295, %s2736_s21   ;;  %s2736_s21 = sphi %s2843_s21, %s3959_s21   ;;  %s2732_s20 = sphi %s2841_s20, %s3961_s20   ;;  %s2728_s19 = sphi %s2839_s19, %s3963_s19   ;;  %s2724_s18 = sphi %s2837_s18, %s3962_s18  }
   0x7   : > { %s2336_s23 = sadd.s32 4294967294, %s2736_s21   ;;  %s2862_s24 = sadd.s32 1, %s2736_s21  }
   0x8   : > { %3917 = sst [smem:[#allocation6_spill]] %s2862_s24  ;;  %s355_s25 = sadd.s32 1, %s2732_s20 }
   0x9   : > { %s352_s26 = ssub.s32 %s2736_s21, %s2862_s24  ;;  %p365_p0 = scmp.ne.s32.totalorder %s2732_s20, %s2728_s19 }
   0xa   : > { %p353_p1 = scmp.eq.s32.totalorder %s352_s26, 0  ;;  %p366_p2 = scmp.eq.s32.totalorder %s2858_s22, 1 }
   0xb   : > { %p371_p3 = scmp.ne.s32.totalorder %s2728_s19, %s2724_s18  ;;  %p372_p4 = scmp.eq.s32.totalorder %s2336_s23, 1 }
   0xc   : > { %s2873_s27 = scalar_select %p353_p1, %s2732_s20, %s355_s25  }
   0xd   : > { %p2875_p5 = por %p366_p2, %p365_p0  ;;  %p2879_p6 = por %p372_p4, %p371_p3 }
   0xe   : > { %3918 = sst [smem:[#allocation7_spill]] %s2873_s27  ;;  %p2339_p7 = scmp.ge.s32.totalorder %s2736_s21, 1 }
   0xf   : > { %s3920_s29 = scalar_select %p2879_p6, 1, 0 }
  0x10   : > { %p439_p8 = scmp.lt.s32.totalorder %s2736_s21, 3 }
  0x11   : > { %3921 = sst [smem:[#allocation8_spill]] %s3920_s29 }
  0x12   : > { %p440_p9 = pnand %p2339_p7, %p439_p8 }
  0x14   : > { %443 = sbr.rel (%p440_p9) target bundleno = 2086 (0x826), region = 80 }
  0x1b   : > { %p486_p10 = scmp.lt.s32.totalorder %s2858_s22, 1  ;;  %v3907_v0 = vmov 0.0   ;;  %vm2739_vm0 = vmmov 0   ;;  %v2740_v1 = vmov 0   ;;  %v506_v2 = vld [vmem:[%s3879_s2 + $0x28] sm:$0xff]  ;;  %s3922_s0 = sld [smem:[#allocation20_spill]] }
  0x1c   : > { %2412 = vmatprep.subr.bf16.mxu1 %v3907_v0  ;;  %2424 = vmatprep.subr.bf16.mxu0 %v3907_v0  ;;  %v502_v3 = vld [vmem:[%s3879_s2 + $0x8] sm:$0xff]  ;;  %vm554_vm1 = vcmask 261120   ;;  %v508_v5 = vld [vmem:[%s3879_s2 + $0x38] sm:$0xff]  ;;  %v503_v9 = vld [vmem:[%s3879_s2 + $0x10] sm:$0xff]  ;;  %s3923_s1 = sld [smem:[#allocation21_spill]]  ;;  %vm815_vm2 = vcmask 64512  }
  0x1d   : > { %s487_s30 = scalar_select %p486_p10, %s2858_s22, 1  ;;  %2414 = vmatprep.mubr.msk.bf16.mxu1 %vm2739_vm0, %v3907_v0  ;;  %2426 = vmatprep.mubr.msk.bf16.mxu0 %vm2739_vm0, %v3907_v0  ;;  %v504_v7 = vld [vmem:[%s3879_s2 + $0x18] sm:$0xff]  ;;  %v501_v12 = vld [vmem:[%s3879_s2] sm:$0xff]  ;;  %v507_v13 = vld [vmem:[%s3879_s2 + $0x30] sm:$0xff]  ;;  %vm1099_vm3 = vcmask 1046528   ;;  %vm822_vm4 = vcmask 1043456  }
  0x1e   : > { %2550 = vset.pattern.permute.xlu1 %v2740_v1  ;;  %2549 = vset.pattern.permute.xlu0 %v2740_v1  ;;  %v505_v14 = vld [vmem:[%s3879_s2 + $0x20] sm:$0xff]  ;;  %v783_v15 = vld [vmem:[%s3881_s4 + $0x10] sm:$0xff]  ;;  %v782_v17 = vld [vmem:[%s3881_s4 + $0x8] sm:$0xff]  ;;  %s2741_s24 = smov 7   ;;  %vm1416_vm5 = vcmask 56320   ;;  %vm1421_vm6 = vcmask 121856  }
  0x1f   : > { %s2341_s16 = sshll.u32 %s487_s30, 3  ;;  %536 = vperm.xlu1 %2550, %v506_v2   ;;  %516 = vperm.xlu0 %2549, %v502_v3   ;;  %v781_v18 = vld [vmem:[%s3881_s4] sm:$0xff]  ;;  %v784_v19 = vld [vmem:[%s3881_s4 + $0x18] sm:$0x3f]  ;;  %v1137_v20 = vld [vmem:[%s3882_s5 + $0x8] sm:$0x7f] }
  0x20   : > { %v1136_v22 = vld [vmem:[%s3882_s5] sm:$0xff]  ;;  %v1139_v23 = vld [vmem:[%s3882_s5 + $0x18] sm:$0x7f]  ;;  %v1138_v24 = vld [vmem:[%s3882_s5 + $0x10] sm:$0xff]  ;;  %s2742_s29 = smov 127   ;;  %s2743_s26 = smov 126  }
  0x21   : > { %s2899_s27 = scalar_lea.vmem %s3922_s0, %s2341_s16  ;;  %v1141_v25 = vld [vmem:[%s3882_s5 + $0x28] sm:$0x7f]  ;;  %v1140_v26 = vld [vmem:[%s3882_s5 + $0x20] sm:$0xff]  ;;  %v1143_v27 = vld [vmem:[%s3882_s5 + $0x38] sm:$0x7f]  ;;  %s3899_s30 = smov 125  }
  0x22   : > { %v491_v4 = vld [vmem:[%s2899_s27] sm:$0xff]  ;;  %v2552_v11 = vld [vmem:[%s3923_s1 + $0x10] sm:$0xff]   ;;  %v2553_v16 = vld [vmem:[%s3923_s1 + $0x8] sm:$0xff]   ;;  %s3897_s17 = smov 124   ;;  %s3898_s23 = smov 123   ;;  %vm1212_vm7 = vcmask 64519  }
  0x23   : > { %v492_v6 = vpack.c.bf16 %v491_v4, %v491_v4  ;;  %546 = vperm.xlu1 %2550, %v508_v5   ;;  %v2551_v10 = vld [vmem:[%s3923_s1] sm:$0xff]   ;;  %526 = vperm.xlu0 %2549, %v504_v7   ;;  %v2554_v21 = vld [vmem:[%s3923_s1 + $0x18] sm:$0xff]   ;;  %v1142_v28 = vld [vmem:[%s3882_s5 + $0x30] sm:$0xff]  ;;  %s3900_s16 = smov 122   ;;  %s2748_s20 = smov 121   ;;  %vm1216_vm8 = vcmask 62464  }
  0x24   : > { %v2985_v33 = vld [vmem:[%s3880_s3] sm:$0xff]   ;;  %s2750_s0 = smov 119   ;;  %s2751_s25 = smov 118   ;;  %vm1322_vm9 = vcmask 1040384   ;;  %vm1352_vm10 = vcmask 63488   ;;  %vm2188_vm11 = vcmask 523264  }
  0x25   : > { %v559_v8 = vsel %vm554_vm1, %v492_v6, 0 }
  0x26   : > { %2413 = vmatpush3.bf16.xpose.msra.mxu1 %v559_v8  ;;  %2425 = vmatpush3.bf16.xpose.msra.mxu0 %v559_v8 }
  0x27   : > { %2418 = vmatprep.subr.bf16.mxu1 %v3907_v0  ;;  %521 = vperm.xlu1 %2550, %v503_v9  }
  0x28   : > { %511 = vperm.xlu0 %2549, %v501_v12  }
  0x2b   : > { %541 = vperm.xlu1 %2550, %v507_v13  }
  0x2c   : > { %531 = vperm.xlu0 %2549, %v505_v14  }
  0x2d   : > { %2415 = vmatmul.mubr.msk.bf16.vlgmr.msra.gmra.mrb[0].mxu1 %vm554_vm1, %v2551_v10  ;;  %2427 = vmatmul.mubr.msk.bf16.vlgmr.msra.gmra.mrb[0].mxu0 %vm554_vm1, %v2552_v11 }
  0x2e   : > { %2419 = vmatpush3.bf16.xpose.msra.mxu1 %v559_v8  ;;  %2420 = vmatprep.mubr.msk.bf16.mxu1 %vm2739_vm0, %v3907_v0 }
  0x2f   : > { %2430 = vmatprep.subr.bf16.mxu1 %v3907_v0  ;;  %797 = vperm.xlu1 %2550, %v783_v15  }
  0x30   : > { %792 = vperm.xlu0 %2549, %v782_v17   ;;  %2438 = vmatprep.mubr.msk.bf16.mxu0 %vm815_vm2, %v2985_v33 }
  0x33   : > { %787 = vperm.xlu1 %2550, %v781_v18  }
  0x34   : > { %802 = vperm.xlu0 %2549, %v784_v19  }
  0x35   : > { %2421 = vmatmul.mubr.msk.bf16.vlgmr.msra.gmra.mrb[4].mxu1 %vm554_vm1, %v2553_v16 }
  0x36   : > { %2431 = vmatpush3.bf16.xpose.msra.mxu1 %v559_v8  ;;  %2432 = vmatprep.mubr.msk.bf16.mxu1 %vm2739_vm0, %v3907_v0 }
  0x37   : > { %1150 = vperm.xlu1 %2550, %v1137_v20  }
  0x38   : > { %1146 = vperm.xlu0 %2549, %v1136_v22  }
  0x3b   : > { %1158 = vperm.xlu1 %2550, %v1139_v23  }
  0x3c   : > { %1154 = vperm.xlu0 %2549, %v1138_v24  }
  0x3d   : > { %2433 = vmatmul.mubr.msk.bf16.vlgmr.msra.gmra.mrb[8].mxu1 %vm554_vm1, %v2554_v21 }
  0x3e   : > { %2444 = vmatprep.mubr.msk.bf16.mxu1 %vm815_vm2, %v2985_v33 }
  0x3f   : > { %1166 = vperm.xlu1 %2550, %v1141_v25  }
  0x40   : > { %1162 = vperm.xlu0 %2549, %v1140_v26  }
  0x43   : > { %1174 = vperm.xlu1 %2550, %v1143_v27  }
  0x44   : > { %1170 = vperm.xlu0 %2549, %v1142_v28  }
  0x9e   : > { %v537_v29 = vpop.permute.xlu1 %536  ;;  %v517_v30 = vpop.permute.xlu0 %516 }
  0xa2   : > { %v547_v31 = vpop.permute.xlu1 %546  ;;  %v527_v32 = vpop.permute.xlu0 %526 }
  0xa6   : > { %v2987_v34 = vpop.permute.xlu1 %521 }
  0xa7   : > { %v2993_v35 = vpop.permute.xlu0 %511 }
  0xaa   : > { %v2995_v36 = vpop.permute.xlu1 %541 }
  0xab   : > { %v2997_v37 = vpop.permute.xlu0 %531 }
  0xae   : > { %v2999_v38 = vpop.permute.xlu1 %797 }
  0xaf   : > { %v3001_v39 = vpop.permute.xlu0 %792 }
  0xb2   : > { %v3003_v40 = vpop.permute.xlu1 %787 }
  0xb3   : > { %v3005_v41 = vpop.permute.xlu0 %802 }
  0xb6   : > { %v3007_v42 = vpop.permute.xlu1 %1150 }
  0xb7   : > { %v1177_v43 = vrot.slane %v3007_v42, 1  ;;  %v3010_v44 = vpop.permute.xlu0 %1146 }
  0xb8   : > { %v1176_v45 = vrot.slane %v3010_v44, 1 }
  0xba   : > { %v3018_v46 = vsel %vm1099_vm3, %v1176_v45, %v1177_v43  ;;  %v3020_v47 = vpop.permute.xlu1 %1158 }
  0xbb   : > { %v1180_v48 = vrot.slane %v3020_v47, 1  ;;  %v3023_v49 = vpop.permute.xlu0 %1154 }
  0xbc   : > { %v1179_v50 = vrot.slane %v3023_v49, 1 }
  0xbe   : > { %v3031_v51 = vsel %vm1099_vm3, %v1179_v50, %v1180_v48  ;;  %v3033_v52 = vpop.permute.xlu1 %1166 }
  0xbf   : > { %v1183_v53 = vrot.slane %v3033_v52, 1  ;;  %v3036_v54 = vpop.permute.xlu0 %1162 }
  0xc0   : > { %v1182_v55 = vrot.slane %v3036_v54, 1 }
  0xc2   : > { %v3044_v56 = vsel %vm1099_vm3, %v1182_v55, %v1183_v53 }
 0x100   : > { %v595_v57 = vpop.f32.mrb[0].mxu1  ;;  %v693_v58 = vpop.f32.mrb[0].mxu0 }
 0x101   : > { %v2416_v59 = vpop.f32.mrb[1].mxu1  ;;  %v2428_v60 = vpop.f32.mrb[1].mxu0  ;;  %v596_v28 = vadd.f32 %v595_v57, %v2993_v35  ;;  %v2556_v35 = vld [vmem:[%s3880_s3 + $0x8] sm:$0x7f]  }
 0x102   : > { %v598_v61 = vpop.f32.mrb[2].mxu1  ;;  %v696_v62 = vpop.f32.mrb[2].mxu0 }
 0x103   : > { %v599_v63 = vadd.f32 %v598_v61, %v517_v30  ;;  %v697_v1 = vadd.f32 %v696_v62, %v537_v29  ;;  %v2417_v2 = vpop.f32.mrb[3].mxu1  ;;  %v2429_v3 = vpop.f32.mrb[3].mxu0  ;;  %v694_v30 = vadd.f32 %v693_v58, %v2997_v37 }
 0x105   : > { %v749_v4 = vsub.f32 0.0, %v599_v63  ;;  %v751_v5 = vsub.f32 0.0, %v697_v1 }
 0x107   : > { %v753_v6 = vmul.f32 1.442695, %v749_v4  ;;  %v757_v7 = vmul.f32 1.442695, %v751_v5 }
 0x108   : > { %v644_v8 = vpop.f32.mrb[4].mxu1 }
 0x109   : > { %2565 = vpow2.f32 %v753_v6  ;;  %v2422_v9 = vpop.f32.mrb[5].mxu1  ;;  %v645_v37 = vadd.f32 %v644_v8, %v2987_v34 }
 0x10a   : > { %2567 = vpow2.f32 %v757_v7  ;;  %v647_v10 = vpop.f32.mrb[6].mxu1 }
 0x10b   : > { %v648_v11 = vadd.f32 %v647_v10, %v527_v32  ;;  %v2423_v12 = vpop.f32.mrb[7].mxu1 }
 0x10d   : > { %v750_v13 = vsub.f32 0.0, %v648_v11  ;;  %v3087_v11 = vpop.permute.xlu0 %1170 }
 0x10e   : > { %v1185_v52 = vrot.slane %v3087_v11, 1 }
 0x10f   : > { %v755_v14 = vmul.f32 1.442695, %v750_v13 }
 0x110   : > { %v742_v15 = vpop.f32.mrb[8].mxu1 }
 0x111   : > { %2569 = vpow2.f32 %v755_v14  ;;  %v2434_v16 = vpop.f32.mrb[9].mxu1  ;;  %v743_v4 = vadd.f32 %v742_v15, %v2995_v36  ;;  %v3079_v36 = vpop.permute.xlu1 %1174 }
 0x112   : > { %v745_v17 = vpop.f32.mrb[10].mxu1 }
 0x113   : > { %v2566_v18 = vpop.eup %2565  ;;  %v746_v19 = vadd.f32 %v745_v17, %v547_v31  ;;  %v2435_v20 = vpop.f32.mrb[11].mxu1 }
 0x114   : > { %v2568_v21 = vpop.eup %2567  ;;  %v761_v22 = vadd.f32 1.0, %v2566_v18 }
 0x115   : > { %v763_v23 = vadd.f32 1.0, %v2568_v21  ;;  %v752_v24 = vsub.f32 0.0, %v746_v19 }
 0x116   : > { %2571 = vrcp.f32 %v761_v22 }
 0x117   : > { %2573 = vrcp.f32 %v763_v23  ;;  %v759_v25 = vmul.f32 1.442695, %v752_v24 }
 0x119   : > { %2575 = vpow2.f32 %v759_v25 }
 0x11b   : > { %v2570_v26 = vpop.eup %2569 }
 0x11c   : > { %v762_v27 = vadd.f32 1.0, %v2570_v26 }
 0x11e   : > { %2577 = vrcp.f32 %v762_v27 }
 0x120   : > { %v2572_v29 = vpop.eup %2571 }
 0x121   : > { %v2574_v32 = vpop.eup %2573  ;;  %v769_v59 = vmul.f32 %v2572_v29, %v596_v28 }
 0x122   : > { %v771_v31 = vmul.f32 %v2574_v32, %v694_v30 }
 0x123   : > { %v2576_v60 = vpop.eup %2575  ;;  %1404 = vrot.lane.b32.xlu1 %v769_v59, %s2741_s24  ;;  %v773_v61 = vpack.c.bf16 %v769_v59, %v769_v59 }
 0x124   : > { %v764_v62 = vadd.f32 1.0, %v2576_v60  ;;  %v775_v1 = vpack.c.bf16 %v771_v31, %v771_v31 }
 0x125   : > { %2488 = vmatprep.subr.msk.bf16.mxu0 %vm822_vm4, %v773_v61  ;;  %v824_v63 = vsel %vm822_vm4, %v773_v61, 0 }
 0x126   : > { %2579 = vrcp.f32 %v764_v62  ;;  %2437 = vmatpush3.bf16.msra.mxu0 %v824_v63  ;;  %v928_v58 = vsel %vm822_vm4, %v775_v1, 0 }
 0x127   : > { %1408 = vrot.lane.b32.xlu1 %v771_v31, %s2741_s24  ;;  %2490 = vmatprep.subr.msk.bf16.mxu0 %vm822_vm4, %v775_v1 }
 0x128   : > { %v2578_v57 = vpop.eup %2577 }
 0x129   : > { %2439 = vmatmul.mubr.msk.bf16.vlgmr.msra.gmra.mrb[4].mxu0 %vm815_vm2, %v2556_v35  ;;  %v770_v2 = vmul.f32 %v2578_v57, %v645_v37 }
 0x12a   : > { %2449 = vmatpush3.bf16.msra.mxu0 %v928_v58  ;;  %2450 = vmatprep.mubr.msk.bf16.mxu0 %vm815_vm2, %v2985_v33 }
 0x12b   : > { %1406 = vrot.lane.b32.xlu0 %v770_v2, %s2741_s24  ;;  %v774_v3 = vpack.c.bf16 %v770_v2, %v770_v2  ;;  %2460 = vmatprep.subr.bf16.mxu0 %v3907_v0 }
 0x12d   : > { %2489 = vmatprep.subr.msk.bf16.mxu1 %vm822_vm4, %v774_v3  ;;  %v876_v34 = vsel %vm822_vm4, %v774_v3, 0 }
 0x12e   : > { %2443 = vmatpush3.bf16.msra.mxu1 %v876_v34 }
 0x130   : > { %v2580_v5 = vpop.eup %2579 }
 0x131   : > { %2445 = vmatmul.mubr.msk.bf16.vlgmr.msra.gmra.mrb[12].mxu1 %vm815_vm2, %v2556_v35  ;;  %2451 = vmatmul.mubr.msk.bf16.vlgmr.msra.gmra.mrb[8].mxu0 %vm815_vm2, %v2556_v35  ;;  %v772_v6 = vmul.f32 %v2580_v5, %v743_v4 }
 0x132   : > { %2456 = vmatprep.mubr.msk.bf16.mxu1 %vm815_vm2, %v2985_v33  ;;  %2464 = vmatprep.mubr.msk.bf16.mxu0 %vm2739_vm0, %v3907_v0 }
 0x133   : > { %1410 = vrot.lane.b32.xlu0 %v772_v6, %s2741_s24  ;;  %v776_v7 = vpack.c.bf16 %v772_v6, %v772_v6  ;;  %s3905_s24 = smov 120  }
 0x135   : > { %2491 = vmatprep.subr.msk.bf16.mxu1 %vm822_vm4, %v776_v7  ;;  %v980_v8 = vsel %vm822_vm4, %v776_v7, 0 }
 0x136   : > { %2455 = vmatpush3.bf16.msra.mxu1 %v980_v8 }
 0x137   : > { %2468 = vmatprep.subr.bf16.mxu1 %v3907_v0 }
 0x139   : > { %2457 = vmatmul.mubr.msk.bf16.vlgmr.msra.gmra.mrb[16].mxu1 %vm815_vm2, %v2556_v35 }
 0x13a   : > { %2472 = vmatprep.mubr.msk.bf16.mxu1 %vm2739_vm0, %v3907_v0 }
 0x195   : > { %v1405_v33 = vpop.permute.xlu1 %1404 }
 0x196   : > { %v1417_v9 = vsel %vm1416_vm5, 0.0, %v1405_v33 }
 0x197   : > { %v3083_v10 = vsel %vm1421_vm6, %v1417_v9, 0.0 }
 0x198   : > { %1466 = vrot.lane.b32.xlu0 %v3083_v10, %s2742_s29 }
 0x199   : > { %v1409_v12 = vpop.permute.xlu1 %1408 }
 0x19a   : > { %v1419_v13 = vsel %vm1416_vm5, 0.0, %v1409_v12 }
 0x19b   : > { %v3091_v14 = vsel %vm1421_vm6, %v1419_v13, 0.0 }
 0x19c   : > { %1470 = vrot.lane.b32.xlu1 %v3091_v14, %s2742_s29  ;;  %1502 = vrot.lane.b32.xlu0 %v3083_v10, %s2743_s26 }
 0x19d   : > { %v1407_v15 = vpop.permute.xlu0 %1406 }
 0x19e   : > { %v1418_v16 = vsel %vm1416_vm5, 0.0, %v1407_v15 }
 0x19f   : > { %v3099_v17 = vsel %vm1421_vm6, %v1418_v16, 0.0 }
 0x1a0   : > { %3924 = vst [vmem:[#allocation9_spill] sm:$0xff] %v3099_v17  ;;  %1538 = vrot.lane.b32.xlu1 %v3083_v10, %s3899_s30  ;;  %1504 = vrot.lane.b32.xlu0 %v3099_v17, %s2743_s26 }
 0x1a4   : > { %1506 = vrot.lane.b32.xlu1 %v3091_v14, %s2743_s26  ;;  %1540 = vrot.lane.b32.xlu0 %v3099_v17, %s3899_s30 }
 0x1a5   : > { %v1411_v18 = vpop.permute.xlu0 %1410 }
 0x1a6   : > { %v1420_v19 = vsel %vm1416_vm5, 0.0, %v1411_v18 }
 0x1a7   : > { %v3155_v20 = vsel %vm1421_vm6, %v1420_v19, 0.0 }
 0x1a8   : > { %1574 = vrot.lane.b32.xlu1 %v3083_v10, %s3897_s17  ;;  %1576 = vrot.lane.b32.xlu0 %v3099_v17, %s3897_s17 }
 0x1ac   : > { %1542 = vrot.lane.b32.xlu1 %v3091_v14, %s3899_s30  ;;  %1612 = vrot.lane.b32.xlu0 %v3099_v17, %s3898_s23  ;;  %s3901_s30 = smov 115  }
 0x1b0   : > { %1610 = vrot.lane.b32.xlu1 %v3083_v10, %s3898_s23  ;;  %1648 = vrot.lane.b32.xlu0 %v3099_v17, %s3900_s16 }
 0x1b4   : > { %1578 = vrot.lane.b32.xlu1 %v3091_v14, %s3897_s17  ;;  %1684 = vrot.lane.b32.xlu0 %v3099_v17, %s2748_s20  ;;  %s2752_s17 = smov 117  }
 0x1b8   : > { %1646 = vrot.lane.b32.xlu1 %v3083_v10, %s3900_s16  ;;  %1720 = vrot.lane.b32.xlu0 %v3099_v17, %s3905_s24 }
 0x1bc   : > { %1614 = vrot.lane.b32.xlu1 %v3091_v14, %s3898_s23  ;;  %1756 = vrot.lane.b32.xlu0 %v3099_v17, %s2750_s0  ;;  %s2753_s23 = smov 116  }
 0x1c0   : > { %1682 = vrot.lane.b32.xlu1 %v3083_v10, %s2748_s20  ;;  %1792 = vrot.lane.b32.xlu0 %v3099_v17, %s2751_s25 }
 0x1c4   : > { %1650 = vrot.lane.b32.xlu1 %v3091_v14, %s3900_s16  ;;  %1828 = vrot.lane.b32.xlu0 %v3099_v17, %s2752_s17  ;;  %s3903_s16 = smov 114  }
 0x1c8   : > { %1718 = vrot.lane.b32.xlu1 %v3083_v10, %s3905_s24  ;;  %1864 = vrot.lane.b32.xlu0 %v3099_v17, %s2753_s23 }
 0x1cc   : > { %1686 = vrot.lane.b32.xlu1 %v3091_v14, %s2748_s20  ;;  %1900 = vrot.lane.b32.xlu0 %v3099_v17, %s3901_s30  ;;  %s3925_s30 = smov 125  }
 0x1d0   : > { %1754 = vrot.lane.b32.xlu1 %v3083_v10, %s2750_s0  ;;  %1936 = vrot.lane.b32.xlu0 %v3099_v17, %s3903_s16  ;;  %s3926_s16 = smov 124  }
 0x1d4   : > { %1722 = vrot.lane.b32.xlu1 %v3091_v14, %s3905_s24  ;;  %1472 = vrot.lane.b32.xlu0 %v3155_v20, %s2742_s29  ;;  %s3927_s24 = smov 123  }
 0x1d8   : > { %1790 = vrot.lane.b32.xlu1 %v3083_v10, %s2751_s25  ;;  %1508 = vrot.lane.b32.xlu0 %v3155_v20, %s2743_s26  ;;  %s3928_s26 = smov 122  }
 0x1dc   : > { %1758 = vrot.lane.b32.xlu1 %v3091_v14, %s2750_s0  ;;  %1544 = vrot.lane.b32.xlu0 %v3155_v20, %s3925_s30  ;;  %s3929_s30 = smov 120  }
 0x1e0   : > { %1826 = vrot.lane.b32.xlu1 %v3083_v10, %s2752_s17  ;;  %1580 = vrot.lane.b32.xlu0 %v3155_v20, %s3926_s16  ;;  %s3930_s16 = smov 115  }
 0x1e4   : > { %1794 = vrot.lane.b32.xlu1 %v3091_v14, %s2751_s25  ;;  %1616 = vrot.lane.b32.xlu0 %v3155_v20, %s3927_s24 }
 0x1e8   : > { %1468 = vrot.lane.b32.xlu1 %v3099_v17, %s2742_s29  ;;  %1652 = vrot.lane.b32.xlu0 %v3155_v20, %s3928_s26  ;;  %s3931_s29 = smov 114  }
 0x1ec   : > { %1862 = vrot.lane.b32.xlu1 %v3083_v10, %s2753_s23  ;;  %1688 = vrot.lane.b32.xlu0 %v3155_v20, %s2748_s20  ;;  %s483_s20 = sand.u32 1, %s2728_s19  }
 0x1ed   : > { %s2340_s24 = sshll.u32 %s483_s20, 3 }
 0x1f0   : > { %1830 = vrot.lane.b32.xlu1 %v3091_v14, %s2752_s17  ;;  %1724 = vrot.lane.b32.xlu0 %v3155_v20, %s3929_s30  ;;  %s2378_s30 = sshll.u32 %s2858_s22, 7  ;;  %s2756_s22 = smov [#allocation2]  }
 0x1f1   : > { %s3834_s1 = scalar_lea.hbm %s3892_s15, %s2378_s30 }
 0x1f4   : > { %1898 = vrot.lane.b32.xlu1 %v3083_v10, %s3930_s16  ;;  %1760 = vrot.lane.b32.xlu0 %v3155_v20, %s2750_s0  ;;  %s2264_s0 = scalar_lea.sflag [#allocation3], %s483_s20 }
 0x1f8   : > { %1866 = vrot.lane.b32.xlu1 %v3091_v14, %s2753_s23  ;;  %1796 = vrot.lane.b32.xlu0 %v3155_v20, %s2751_s25 }
 0x1fc   : > { %v2440_v21 = vpop.f32.mrb[4].mxu0  ;;  %1934 = vrot.lane.b32.xlu1 %v3083_v10, %s3931_s29  ;;  %1832 = vrot.lane.b32.xlu0 %v3155_v20, %s2752_s17 }
 0x1fd   : > { %v869_v22 = vadd.f32 %v2440_v21, %v2999_v38  ;;  %v860_v23 = vpop.f32.mrb[5].mxu0 }
 0x1fe   : > { %v3203_v24 = vadd.f32 %v860_v23, %v3003_v40  ;;  %v2441_v25 = vpop.f32.mrb[6].mxu0 }
 0x1ff   : > { %v1032_v26 = vsub.f32 0.0, %v869_v22  ;;  %v872_v27 = vadd.f32 %v2441_v25, %v3005_v41  ;;  %v863_v28 = vpop.f32.mrb[7].mxu0 }
 0x200   : > { %v3207_v29 = vadd.f32 %v863_v28, %v3001_v39  ;;  %1902 = vrot.lane.b32.xlu1 %v3091_v14, %s3930_s16  ;;  %1868 = vrot.lane.b32.xlu0 %v3155_v20, %s2753_s23  ;;  %v1100_v59 = vrot.slane %v3203_v24, 1 }
 0x201   : > { %v1045_v30 = vmul.f32 1.442695, %v1032_v26  ;;  %v1033_v32 = vsub.f32 0.0, %v872_v27 }
 0x202   : > { %v1031_v31 = vsub.f32 0.0, %v3207_v29  ;;  %v1101_v60 = vrot.slane %v3207_v29, 1 }
 0x203   : > { %2581 = vpow2.f32 %v1045_v30  ;;  %v1047_v61 = vmul.f32 1.442695, %v1033_v32 }
 0x204   : > { %v1043_v62 = vmul.f32 1.442695, %v1031_v31  ;;  %v3221_v63 = vsel %vm1099_vm3, %v1100_v59, %v1101_v60  ;;  %v2452_v1 = vpop.f32.mrb[8].mxu0  ;;  %1904 = vrot.lane.b32.xlu1 %v3155_v20, %s3930_s16  ;;  %1938 = vrot.lane.b32.xlu0 %v3091_v14, %s3931_s29  ;;  %v2446_v35 = vpop.f32.mrb[12].mxu1  ;;  %s485_s16 = scalar_lea.vmem [#allocation2], %s2340_s24  ;;  %s2678_s24 = sshll.u32 %s2756_s22, 4  ;;  %s2679_s24 = int_to_ptr.vmem [resolvable:$false] %s2678_s24 }
 0x205   : > { %2583 = vpow2.f32 %v1047_v61  ;;  %v973_v37 = vadd.f32 %v2452_v1, %v2999_v38  ;;  %v921_v57 = vadd.f32 %v2446_v35, %v2999_v38  ;;  %v912_v58 = vpop.f32.mrb[13].mxu1  ;;  %v964_v2 = vpop.f32.mrb[9].mxu0 }
 0x206   : > { %2585 = vpow2.f32 %v1043_v62  ;;  %v3230_v3 = vadd.f32 %v912_v58, %v3003_v40  ;;  %v3233_v34 = vadd.f32 %v964_v2, %v3003_v40  ;;  %v2447_v4 = vpop.f32.mrb[14].mxu1  ;;  %v2453_v5 = vpop.f32.mrb[10].mxu0 }
 0x207   : > { %v1038_v6 = vsub.f32 0.0, %v973_v37  ;;  %v1035_v7 = vsub.f32 0.0, %v921_v57  ;;  %v924_v8 = vadd.f32 %v2447_v4, %v3005_v41  ;;  %v976_v33 = vadd.f32 %v2453_v5, %v3005_v41  ;;  %v915_v9 = vpop.f32.mrb[15].mxu1  ;;  %v967_v12 = vpop.f32.mrb[11].mxu0 }
 0x208   : > { %v1103_v13 = vrot.slane %v3230_v3, 1  ;;  %v3239_v15 = vadd.f32 %v915_v9, %v3001_v39  ;;  %v3242_v16 = vadd.f32 %v967_v12, %v3001_v39  ;;  %1940 = vrot.lane.b32.xlu1 %v3155_v20, %s3931_s29  ;;  %v1106_v30 = vrot.slane %v3233_v34, 1  ;;  %s2277_s29 = sshll.u32 %s485_s16, 4  ;;  %s3836_s29 = int_to_ptr.vmem [resolvable:$true] %s2277_s29 }
 0x209   : > { %v1057_v18 = vmul.f32 1.442695, %v1038_v6  ;;  %v1051_v19 = vmul.f32 1.442695, %v1035_v7  ;;  %v1036_v21 = vsub.f32 0.0, %v924_v8  ;;  %v1039_v22 = vsub.f32 0.0, %v976_v33  ;;  %p2681_p0 = scmp.lt.s32.totalorder %s3836_s29, %s2679_s24 }
 0x20a   : > { %v1034_v23 = vsub.f32 0.0, %v3239_v15  ;;  %v1104_v25 = vrot.slane %v3239_v15, 1  ;;  %v1037_v26 = vsub.f32 0.0, %v3242_v16  ;;  %v1107_v27 = vrot.slane %v3242_v16, 1  ;;  %v3250_v28 = vpop.permute.xlu0 %1466  ;;  %s2674_s25 = scalar_lea.vmem %s3836_s29, 128 }
 0x20b   : > { %2587 = vpow2.f32 %v1057_v18  ;;  %v1053_v32 = vmul.f32 1.442695, %v1036_v21  ;;  %v1059_v31 = vmul.f32 1.442695, %v1039_v22  ;;  %p2675_p11 = scmp.ne.s32.totalorder %s3836_s29, %s2674_s25 }
 0x20c   : > { %2589 = vpow2.f32 %v1051_v19  ;;  %v1049_v61 = vmul.f32 1.442695, %v1034_v23  ;;  %v3258_v62 = vsel %vm1099_vm3, %v1103_v13, %v1104_v25  ;;  %v2458_v1 = vpop.f32.mrb[16].mxu1  ;;  %v1055_v37 = vmul.f32 1.442695, %v1037_v26 }
 0x20d   : > { %v2582_v35 = vpop.eup %2581  ;;  %2591 = vpow2.f32 %v1053_v32  ;;  %v3265_v57 = vsel %vm1099_vm3, %v1106_v30, %v1107_v27  ;;  %v1025_v58 = vadd.f32 %v2458_v1, %v2999_v38  ;;  %v1016_v2 = vpop.f32.mrb[17].mxu1  ;;  %p2676_p12 = pnand %p2675_p11, %p2875_p5 }
 0x20e   : > { %v1068_v4 = vadd.f32 1.0, %v2582_v35  ;;  %2593 = vpow2.f32 %v1059_v31  ;;  %v3268_v5 = vpop.permute.xlu1 %1470  ;;  %v3270_v6 = vpop.permute.xlu0 %1502  ;;  %v3273_v33 = vadd.f32 %v1016_v2, %v3003_v40 }
 0x20f   : > { %v2584_v7 = vpop.eup %2583  ;;  %2595 = vpow2.f32 %v1049_v61  ;;  %v1041_v8 = vsub.f32 0.0, %v1025_v58  ;;  %v2459_v9 = vpop.f32.mrb[18].mxu1  ;;  %p2677_p13 = pneg %p2676_p12 }
 0x210   : > { %v2586_v12 = vpop.eup %2585  ;;  %2597 = vrcp.f32 %v1068_v4  ;;  %v1069_v18 = vadd.f32 1.0, %v2584_v7  ;;  %v1028_v19 = vadd.f32 %v2459_v9, %v3005_v41  ;;  %v1019_v38 = vpop.f32.mrb[19].mxu1  ;;  %v3906_v40 = vrot.slane %v3273_v33, 1 }
 0x211   : > { %v1067_v21 = vadd.f32 1.0, %v2586_v12  ;;  %2599 = vpow2.f32 %v1055_v37  ;;  %v1063_v22 = vmul.f32 1.442695, %v1041_v8  ;;  %v3277_v23 = vadd.f32 %v1019_v38, %v3001_v39 }
 0x212   : > { %2601 = vrcp.f32 %v1069_v18  ;;  %v1042_v26 = vsub.f32 0.0, %v1028_v19  ;;  %v3279_v32 = vpop.permute.xlu1 %1538  ;;  %v3281_v31 = vpop.permute.xlu0 %1504 }
 0x213   : > { %2603 = vrcp.f32 %v1067_v21  ;;  %v1040_v61 = vsub.f32 0.0, %v3277_v23  ;;  %v1110_v41 = vrot.slane %v3277_v23, 1 }
 0x214   : > { %2605 = vpow2.f32 %v1063_v22  ;;  %v1065_v1 = vmul.f32 1.442695, %v1042_v26 }
 0x215   : > { %v2588_v35 = vpop.eup %2587  ;;  %v1061_v37 = vmul.f32 1.442695, %v1040_v61  ;;  %v3291_v39 = vsel %vm1099_vm3, %v3906_v40, %v1110_v41 }
 0x216   : > { %v2590_v58 = vpop.eup %2589  ;;  %v1074_v2 = vadd.f32 1.0, %v2588_v35  ;;  %2607 = vpow2.f32 %v1065_v1  ;;  %v3293_v4 = vpop.permute.xlu1 %1506 }
 0x217   : > { %v3295_v7 = vpop.permute.xlu0 %1540  ;;  %v2592_v8 = vpop.eup %2591  ;;  %v1071_v9 = vadd.f32 1.0, %v2590_v58  ;;  %2609 = vpow2.f32 %v1061_v37 }
 0x218   : > { %v2594_v12 = vpop.eup %2593  ;;  %2611 = vrcp.f32 %v1074_v2  ;;  %v1072_v18 = vadd.f32 1.0, %v2592_v8 }
 0x219   : > { %v2596_v19 = vpop.eup %2595  ;;  %2613 = vrcp.f32 %v1071_v9  ;;  %v1075_v38 = vadd.f32 1.0, %v2594_v12 }
 0x21a   : > { %v2598_v21 = vpop.eup %2597  ;;  %2615 = vrcp.f32 %v1072_v18  ;;  %v1070_v22 = vadd.f32 1.0, %v2596_v19  ;;  %v3297_v26 = vpop.permute.xlu1 %1574 }
 0x21b   : > { %v3299_v61 = vpop.permute.xlu0 %1576  ;;  %v2600_v1 = vpop.eup %2599  ;;  %v1125_v35 = vmul.f32 %v2598_v21, %v3221_v63  ;;  %2617 = vrcp.f32 %v1075_v38 }
 0x21c   : > { %v2602_v40 = vpop.eup %2601  ;;  %2619 = vrcp.f32 %v1070_v22  ;;  %v1073_v37 = vadd.f32 1.0, %v2600_v1 }
 0x21d   : > { %v2604_v58 = vpop.eup %2603  ;;  %v1126_v2 = vmul.f32 %v2602_v40, %v1101_v60  ;;  %v3305_v8 = vadd.f32 %v3018_v46, %v1125_v35 }
 0x21e   : > { %v2606_v9 = vpop.eup %2605  ;;  %v1124_v12 = vmul.f32 %v2604_v58, %v1100_v59  ;;  %2621 = vrcp.f32 %v1073_v37  ;;  %v3309_v18 = vpop.permute.xlu1 %1542 }
 0x21f   : > { %v3311_v19 = vpop.permute.xlu0 %1612  ;;  %v3315_v63 = vadd.f32 %v1177_v43, %v1126_v2  ;;  %v1077_v38 = vadd.f32 1.0, %v2606_v9  ;;  %v1214_v42 = vsel %vm815_vm2, %v3305_v8, -inf }
 0x220   : > { %v2608_v29 = vpop.eup %2607  ;;  %v3319_v46 = vadd.f32 %v1176_v45, %v1124_v12 }
 0x221   : > { %v2610_v60 = vpop.eup %2609  ;;  %2623 = vrcp.f32 %v1077_v38  ;;  %v1078_v24 = vadd.f32 1.0, %v2608_v29  ;;  %v1217_v37 = vsel %vm1216_vm8, %v3315_v63, -inf }
 0x222   : > { %v2612_v59 = vpop.eup %2611  ;;  %v1213_v40 = vsel %vm1212_vm7, %v3319_v46, -inf  ;;  %v1076_v43 = vadd.f32 1.0, %v2610_v60  ;;  %v3325_v21 = vpop.permute.xlu1 %1610 }
 0x223   : > { %v3327_v22 = vpop.permute.xlu0 %1648  ;;  %v2614_v1 = vpop.eup %2613  ;;  %v1215_v44 = vmax.f32 %v1213_v40, %v1214_v42  ;;  %v1131_v45 = vmul.f32 %v2612_v59, %v3265_v57  ;;  %2625 = vrcp.f32 %v1078_v24 }
 0x224   : > { %v2616_v35 = vpop.eup %2615  ;;  %v1128_v58 = vmul.f32 %v2614_v1, %v3258_v62  ;;  %2627 = vrcp.f32 %v1076_v43  ;;  %v2557_v62 = vld [vmem:[%s3883_s6] sm:$0xff]  }
 0x225   : > { %v2618_v2 = vpop.eup %2617  ;;  %v1218_v9 = vmax.f32 %v1215_v44, %v1217_v37  ;;  %v1129_v12 = vmul.f32 %v2616_v35, %v1104_v25  ;;  %v3336_v38 = vadd.f32 %v3044_v56, %v1131_v45  ;;  %2461 = vmatpush3.bf16.msra.mxu0 %v2557_v62 }
 0x226   : > { %v2620_v29 = vpop.eup %2619  ;;  %v3339_v60 = vadd.f32 %v3031_v51, %v1128_v58  ;;  %v1132_v57 = vmul.f32 %v2618_v2, %v1107_v27  ;;  %v3343_v24 = vpop.permute.xlu1 %1578  ;;  %v2558_v27 = vld [vmem:[%s3883_s6 + $0x8] sm:$0xff]   ;;  %2462 = vmatprep.subr.bf16.mxu0 %v3907_v0 }
 0x227   : > { %v3345_v59 = vpop.permute.xlu0 %1684  ;;  %v1219_v15 = vrot.slane %v1218_v9, 4  ;;  %v1127_v56 = vmul.f32 %v2620_v29, %v1103_v13  ;;  %v3354_v25 = vadd.f32 %v1180_v48, %v1129_v12  ;;  %v1186_v48 = vrot.slane %v3079_v36, 1 }
 0x228   : > { %v2622_v51 = vpop.eup %2621  ;;  %v3358_v16 = vadd.f32 %v1183_v53, %v1132_v57  ;;  %v1237_v35 = vsel %vm815_vm2, %v3336_v38, -inf  ;;  %v3932_v57 = vrot.slane %v3273_v33, 1 }
 0x229   : > { %v1220_v40 = vmax.f32 %v1218_v9, %v1219_v15  ;;  %v3365_v42 = vadd.f32 %v1179_v50, %v1127_v56  ;;  %v1130_v47 = vmul.f32 %v2622_v51, %v1106_v30  ;;  %v1226_v50 = vsel %vm815_vm2, %v3339_v60, -inf  ;;  %2463 = vmatpush3.bf16.msra.mxu0 %v2558_v27 }
 0x22a   : > { %v3372_v53 = vpop.permute.xlu1 %1646  ;;  %v1228_v44 = vsel %vm1216_vm8, %v3354_v25, -inf  ;;  %2476 = vmatprep.subr.bf16.mxu0 %v3907_v0  ;;  %v1239_v29 = vsel %vm1216_vm8, %v3358_v16, -inf }
 0x22b   : > { %v3374_v3 = vpop.permute.xlu0 %1720  ;;  %v2624_v13 = vpop.eup %2623  ;;  %v1221_v43 = vrot.slane %v1220_v40, 2  ;;  %v1225_v49 = vsel %vm1212_vm7, %v3365_v42, -inf  ;;  %v3382_v34 = vadd.f32 %v1182_v55, %v1130_v47  ;;  %v1187_v55 = vsel %vm1099_vm3, %v1185_v52, %v1186_v48 }
 0x22c   : > { %v1227_v30 = vmax.f32 %v1225_v49, %v1226_v50  ;;  %v1134_v36 = vmul.f32 %v2624_v13, %v3291_v39 }
 0x22d   : > { %v2626_v11 = vpop.eup %2625  ;;  %v1222_v1 = vmax.f32 %v1220_v40, %v1221_v43  ;;  %v1236_v45 = vsel %vm1212_vm7, %v3382_v34, -inf }
 0x22e   : > { %v2628_v54 = vpop.eup %2627  ;;  %v1229_v37 = vmax.f32 %v1227_v30, %v1228_v44  ;;  %v1238_v58 = vmax.f32 %v1236_v45, %v1237_v35  ;;  %v1135_v39 = vmul.f32 %v2626_v11, %v1110_v41  ;;  %v3395_v2 = vpop.permute.xlu1 %1614  ;;  %v3403_v15 = vadd.f32 %v1187_v55, %v1134_v36 }
 0x22f   : > { %v3397_v9 = vpop.permute.xlu0 %1756  ;;  %v1223_v12 = vrot.slane %v1222_v1, 1  ;;  %v1133_v62 = vmul.f32 %v2628_v54, %v3932_v57  ;;  %v1426_v11 = vlaneseq }
 0x230   : > { %v1230_v56 = vrot.slane %v1229_v37, 4  ;;  %v1240_v51 = vmax.f32 %v1238_v58, %v1239_v29  ;;  %v3407_v23 = vadd.f32 %v1186_v48, %v1135_v39  ;;  %v1248_v50 = vsel %vm815_vm2, %v3403_v15, -inf }
 0x231   : > { %v1224_v27 = vmax.f32 %v1222_v1, %v1223_v12  ;;  %v3405_v40 = vadd.f32 %v1185_v52, %v1133_v62 }
 0x232   : > { %v1231_v41 = vmax.f32 %v1229_v37, %v1230_v56  ;;  %v1241_v47 = vrot.slane %v1240_v51, 4  ;;  %v3409_v13 = vpop.permute.xlu1 %1682  ;;  %v1250_v45 = vsel %vm1216_vm8, %v3407_v23, -inf }
 0x233   : > { %v3411_v43 = vpop.permute.xlu0 %1792  ;;  %v1258_v49 = vmax.f32 %v1224_v27, -10000.0  ;;  %v1247_v33 = vsel %vm1212_vm7, %v3405_v40, -inf }
 0x234   : > { %v1232_v30 = vrot.slane %v1231_v41, 2  ;;  %v1242_v36 = vmax.f32 %v1240_v51, %v1241_v47  ;;  %v1249_v52 = vmax.f32 %v1247_v33, %v1248_v50 }
 0x235   : > { %v1263_v48 = vsub.f32 %v3305_v8, %v1258_v49  ;;  %v1264_v1 = vsub.f32 %v3315_v63, %v1258_v49  ;;  %v1262_v44 = vsub.f32 %v3319_v46, %v1258_v49  ;;  %v1427_v8 = vshrl.u32 %v1426_v11, 7 }
 0x236   : > { %v1233_v35 = vmax.f32 %v1231_v41, %v1232_v30  ;;  %v1243_v54 = vrot.slane %v1242_v36, 2  ;;  %v1251_v55 = vmax.f32 %v1249_v52, %v1250_v45  ;;  %v3422_v37 = vpop.permute.xlu1 %1650  ;;  %v1298_v47 = vsub.f32 -10000.0, %v1258_v49 }
 0x237   : > { %v3424_v58 = vpop.permute.xlu0 %1828  ;;  %v1276_v39 = vmul.f32 1.442695, %v1263_v48  ;;  %v1274_v12 = vmul.f32 1.442695, %v1262_v44  ;;  %v1278_v41 = vmul.f32 1.442695, %v1264_v1 }
 0x238   : > { %v1234_v29 = vrot.slane %v1233_v35, 1  ;;  %v1244_v57 = vmax.f32 %v1242_v36, %v1243_v54  ;;  %v1252_v62 = vrot.slane %v1251_v55, 4  ;;  %v3430_v52 = vsub.s32 7, %v1427_v8 }
 0x239   : > { %2629 = vpow2.f32 %v1276_v39  ;;  %v3435_v44 = vsub.s32 0, %v1427_v8  ;;  %v1302_v54 = vmul.f32 1.442695, %v1298_v47 }
 0x23a   : > { %v1235_v63 = vmax.f32 %v1233_v35, %v1234_v29  ;;  %v1245_v56 = vrot.slane %v1244_v57, 1  ;;  %v1253_v46 = vmax.f32 %v1251_v55, %v1252_v62  ;;  %v3426_v51 = vpop.permute.xlu1 %1718  ;;  %2631 = vpow2.f32 %v1274_v12 }
 0x23b   : > { %v3428_v27 = vpop.permute.xlu0 %1864  ;;  %2633 = vpow2.f32 %v1278_v41  ;;  %v3443_v12 = vsub.s32 2, %v1427_v8  ;;  %v3453_v62 = vsub.s32 1, %v1427_v8 }
 0x23c   : > { %3933 = vst [vmem:[#allocation10_spill] sm:$0xff] %v3428_v27  ;;  %v1259_v33 = vmax.f32 %v1235_v63, -10000.0  ;;  %v1246_v50 = vmax.f32 %v1244_v57, %v1245_v56  ;;  %v1254_v30 = vrot.slane %v1253_v46, 2  ;;  %v3455_v63 = vsub.s32 4, %v1427_v8 }
 0x23d   : > { %v3457_v56 = vsub.s32 5, %v1427_v8 }
 0x23e   : > { %v1265_v36 = vsub.f32 %v3365_v42, %v1259_v33  ;;  %v1266_v48 = vsub.f32 %v3339_v60, %v1259_v33  ;;  %v1267_v11 = vsub.f32 %v3354_v25, %v1259_v33  ;;  %v3437_v45 = vpop.permute.xlu1 %1686  ;;  %v3441_v1 = vmax.f32 %v1246_v50, -10000.0 }
 0x23f   : > { %v3439_v35 = vpop.permute.xlu0 %1900  ;;  %v1255_v49 = vmax.f32 %v1253_v46, %v1254_v30  ;;  %v3445_v42 = vsub.s32 3, %v1427_v8 }
 0x240   : > { %3934 = vst [vmem:[#allocation11_spill] sm:$0xff] %v3439_v35  ;;  %3935 = vst [vmem:[#allocation12_spill] sm:$0xff] %v3441_v1  ;;  %v1282_v55 = vmul.f32 1.442695, %v1266_v48  ;;  %v1284_v39 = vmul.f32 1.442695, %v1267_v11  ;;  %v1269_v60 = vsub.f32 %v3336_v38, %v3441_v1  ;;  %v1270_v25 = vsub.f32 %v3358_v16, %v3441_v1 }
 0x241   : > { %v1268_v29 = vsub.f32 %v3382_v34, %v3441_v1  ;;  %v1256_v57 = vrot.slane %v1255_v49, 1  ;;  %v3465_v16 = vsub.s32 6, %v1427_v8 }
 0x242   : > { %2635 = vpow2.f32 %v1282_v55  ;;  %v3459_v46 = vpop.permute.xlu1 %1754  ;;  %v1288_v38 = vmul.f32 1.442695, %v1269_v60  ;;  %v1299_v55 = vsub.f32 -10000.0, %v1259_v33  ;;  %v1290_v0 = vmul.f32 1.442695, %v1270_v25 }
 0x243   : > { %v3461_v41 = vpop.permute.xlu0 %1936  ;;  %v3463_v47 = vpop.eup %2629  ;;  %v1286_v50 = vmul.f32 1.442695, %v1268_v29  ;;  %2637 = vpow2.f32 %v1302_v54  ;;  %v1257_v30 = vmax.f32 %v1255_v49, %v1256_v57 }
 0x244   : > { %3936 = vst [vmem:[#allocation13_spill] sm:$0xff] %v3461_v41  ;;  %3937 = vst [vmem:[#allocation14_spill] sm:$0xff] %v3463_v47  ;;  %2639 = vpow2.f32 %v1284_v39  ;;  %v1449_v34 = vrot.slane %v3463_v47, %v3435_v44  ;;  %v1525_v48 = vrot.slane %v3463_v47, %v3443_v12  ;;  %v3471_v11 = vpop.eup %2631  ;;  %v1561_v60 = vrot.slane %v3463_v47, %v3445_v42 }
 0x245   : > { %3938 = vst [vmem:[#allocation15_spill] sm:$0xff] %v3471_v11  ;;  %2641 = vpow2.f32 %v1288_v38  ;;  %v1429_v8 = vrot.slane %v3471_v11, %v3430_v52  ;;  %v1489_v39 = vrot.slane %v3463_v47, %v3453_v62  ;;  %v1597_v49 = vrot.slane %v3463_v47, %v3455_v63  ;;  %v3496_v27 = vpop.eup %2633 }
 0x246   : > { %v1478_v54 = vmul.f32 %v3250_v28, %v1449_v34  ;;  %v3482_v29 = vpop.permute.xlu1 %1722  ;;  %2643 = vpow2.f32 %v1286_v50  ;;  %v3486_v33 = vmax.f32 %v1257_v30, -10000.0  ;;  %v1550_v25 = vmul.f32 %v3279_v32, %v1525_v48 }
 0x247   : > { %v3484_v57 = vpop.permute.xlu0 %1472  ;;  %v1633_v38 = vrot.slane %v3463_v47, %v3457_v56  ;;  %v1442_v28 = vmul.f32 %v1429_v8, %v3083_v10  ;;  %v1586_v34 = vmul.f32 %v3297_v26, %v1561_v60  ;;  %v3493_v41 = vmul.f32 1.442695, %v1265_v36 }
 0x248   : > { %3939 = vst [vmem:[#allocation16_spill] sm:$0xff] %v3486_v33  ;;  %2645 = vpow2.f32 %v1290_v0  ;;  %v1272_v50 = vsub.f32 %v3403_v15, %v3486_v33  ;;  %v1273_v32 = vsub.f32 %v3407_v23, %v3486_v33  ;;  %v3502_v30 = vmul.f32 1.442695, %v1299_v55 }
 0x249   : > { %v1482_v10 = vadd.f32 %v1478_v54, %v1442_v28  ;;  %v1514_v26 = vmul.f32 %v3270_v6, %v1489_v39  ;;  %v1271_v36 = vsub.f32 %v3405_v40, %v3486_v33  ;;  %v1622_v35 = vmul.f32 %v3325_v21, %v1597_v49 }
 0x24a   : > { %3940 = vst [vmem:[#allocation17_spill] sm:$0xff] %v3502_v30  ;;  %v1791_v60 = vpop.permute.xlu1 %1790  ;;  %v1294_v0 = vmul.f32 1.442695, %v1272_v50  ;;  %v1658_v15 = vmul.f32 %v3372_v53, %v1633_v38  ;;  %v1669_v23 = vrot.slane %v3463_v47, %v3465_v16  ;;  %v1705_v6 = vrot.slane %v3463_v47, %v3430_v52 }
 0x24b   : > { %v3508_v8 = vpop.permute.xlu0 %1508  ;;  %v1518_v48 = vadd.f32 %v1514_v26, %v1482_v10  ;;  %v1741_v40 = vrot.slane %v3496_v27, %v3435_v44  ;;  %v1777_v54 = vrot.slane %v3496_v27, %v3453_v62  ;;  %v1296_v21 = vmul.f32 1.442695, %v1273_v32 }
 0x24c   : > { %v3514_v55 = vpop.eup %2635  ;;  %2647 = vpow2.f32 %v1294_v0 }
 0x24d   : > { %v3522_v39 = vpop.eup %2637  ;;  %v1493_v53 = vrot.slane %v3514_v55, %v3453_v62  ;;  %v1529_v49 = vrot.slane %v3514_v55, %v3443_v12  ;;  %v1565_v38 = vrot.slane %v3514_v55, %v3445_v42  ;;  %v1554_v50 = vadd.f32 %v1550_v25, %v1518_v48 }
 0x24e   : > { %3941 = vst [vmem:[#allocation18_spill] sm:$0xff] %v3522_v39  ;;  %v3530_v28 = vpop.eup %2639  ;;  %v1601_v10 = vrot.slane %v3514_v55, %v3455_v63  ;;  %v1637_v26 = vrot.slane %v3514_v55, %v3457_v56  ;;  %v3536_v32 = vpop.permute.xlu1 %1758  ;;  %v1694_v48 = vmul.f32 %v3409_v13, %v1669_v23  ;;  %v1730_v23 = vmul.f32 %v3426_v51, %v1705_v6 }
 0x24f   : > { %v3538_v30 = vpop.permute.xlu0 %1544  ;;  %v3540_v33 = vpop.eup %2641  ;;  %v3543_v1 = vmul.f32 %v3281_v31, %v1493_v53  ;;  %v3546_v17 = vmul.f32 %v3295_v7, %v1529_v49  ;;  %v3549_v25 = vmul.f32 %v3299_v61, %v1565_v38  ;;  %v1590_v39 = vadd.f32 %v1586_v34, %v1554_v50 }
 0x250   : > { %v1457_v0 = vrot.slane %v3540_v33, %v3435_v44  ;;  %v1497_v11 = vrot.slane %v3540_v33, %v3453_v62  ;;  %v1533_v47 = vrot.slane %v3540_v33, %v3443_v12  ;;  %v3558_v31 = vpop.eup %2643  ;;  %v3561_v7 = vmul.f32 %v3311_v19, %v1601_v10 }
 0x251   : > { %v3564_v61 = vmul.f32 %v3327_v22, %v1637_v26  ;;  %v1569_v13 = vrot.slane %v3540_v33, %v3445_v42  ;;  %v1437_v53 = vrot.slane %v3558_v31, %v3430_v52  ;;  %v1766_v38 = vmul.f32 %v3459_v46, %v1741_v40 }
 0x252   : > { %v1480_v34 = vmul.f32 %v3268_v5, %v1457_v0  ;;  %v1516_v49 = vmul.f32 %v3293_v4, %v1497_v11  ;;  %v1827_v50 = vpop.permute.xlu1 %1826  ;;  %v3576_v10 = vpop.eup %2645  ;;  %v1552_v22 = vmul.f32 %v3309_v18, %v1533_v47  ;;  %v1626_v26 = vadd.f32 %v1622_v35, %v1590_v39 }
 0x253   : > { %3942 = vst [vmem:[#allocation19_spill] sm:$0xff] %v3564_v61  ;;  %v3574_v19 = vpop.permute.xlu0 %1580  ;;  %v1588_v61 = vmul.f32 %v3343_v24, %v1569_v13  ;;  %v1673_v51 = vrot.slane %v3514_v55, %v3465_v16  ;;  %v1444_v6 = vmul.f32 %v1437_v53, %v3091_v14  ;;  %v1709_v5 = vrot.slane %v3514_v55, %v3430_v52 }
 0x254   : > { %v1605_v4 = vrot.slane %v3540_v33, %v3455_v63  ;;  %v1745_v46 = vrot.slane %v3530_v28, %v3435_v44  ;;  %v1662_v11 = vadd.f32 %v1658_v15, %v1626_v26  ;;  %v1641_v18 = vrot.slane %v3540_v33, %v3457_v56 }
 0x255   : > { %v1292_v35 = vmul.f32 1.442695, %v1271_v36  ;;  %v1802_v24 = vmul.f32 %v1791_v60, %v1777_v54  ;;  %v1484_v47 = vadd.f32 %v1480_v34, %v1444_v6  ;;  %v1781_v14 = vrot.slane %v3530_v28, %v3453_v62 }
 0x256   : > { %v1624_v40 = vmul.f32 %v3395_v2, %v1605_v4  ;;  %v1817_v39 = vrot.slane %v3530_v28, %v3443_v12  ;;  %v1795_v0 = vpop.permute.xlu1 %1794  ;;  %2649 = vpow2.f32 %v1296_v21  ;;  %v3597_v53 = vmul.f32 %v3345_v59, %v1673_v51  ;;  %v3600_v36 = vpop.eup %2647 }
 0x257   : > { %v1617_v13 = vpop.permute.xlu0 %1616  ;;  %v1698_v15 = vadd.f32 %v1694_v48, %v1662_v11  ;;  %v1660_v26 = vmul.f32 %v3422_v37, %v1641_v18  ;;  %v1333_v60 = vrot.slane %v3558_v31, 7  ;;  %v1520_v2 = vadd.f32 %v1516_v49, %v1484_v47 }
 0x258   : > { %v3604_v54 = vmul.f32 %v3374_v3, %v1709_v5  ;;  %v3607_v34 = vmul.f32 %v3397_v9, %v1745_v46  ;;  %v1677_v21 = vrot.slane %v3540_v33, %v3465_v16  ;;  %v1713_v59 = vrot.slane %v3540_v33, %v3430_v52 }
 0x259   : > { %v1734_v6 = vadd.f32 %v1730_v23, %v1698_v15  ;;  %2651 = vpow2.f32 %v1292_v35  ;;  %v1556_v37 = vadd.f32 %v1552_v22, %v1520_v2  ;;  %v3614_v48 = vmul.f32 %v3411_v43, %v1781_v14 }
 0x25a   : > { %v3617_v49 = vmul.f32 %v3424_v58, %v1817_v39  ;;  %v1853_v3 = vrot.slane %v3530_v28, %v3445_v42  ;;  %v1469_v9 = vpop.permute.xlu1 %1468  ;;  %v1461_v4 = vrot.slane %v3600_v36, %v3435_v44  ;;  %v1501_v22 = vrot.slane %v3600_v36, %v3453_v62 }
 0x25b   : > { %v1653_v51 = vpop.permute.xlu0 %1652  ;;  %v1770_v5 = vadd.f32 %v1766_v38, %v1734_v6  ;;  %v1592_v43 = vadd.f32 %v1588_v61, %v1556_v37  ;;  %v1749_v58 = vrot.slane %v3576_v10, %v3435_v44  ;;  %v1537_v46 = vrot.slane %v3600_v36, %v3443_v12 }
 0x25c   : > { %v1813_v11 = vrot.slane %v3496_v27, %v3443_v12  ;;  %v1696_v18 = vmul.f32 %v3437_v45, %v1677_v21  ;;  %v1732_v38 = vmul.f32 %v3482_v29, %v1713_v59  ;;  %v1573_v47 = vrot.slane %v3600_v36, %v3445_v42 }
 0x25d   : > { %v1806_v35 = vadd.f32 %v1802_v24, %v1770_v5  ;;  %v1628_v14 = vadd.f32 %v1624_v40, %v1592_v43  ;;  %v1481_v61 = vmul.f32 %v3484_v57, %v1461_v4  ;;  %v1517_v39 = vmul.f32 %v3508_v8, %v1501_v22 }
 0x25e   : > { %v1838_v15 = vmul.f32 %v1827_v50, %v1813_v11  ;;  %v1863_v2 = vpop.permute.xlu1 %1862  ;;  %v1768_v37 = vmul.f32 %v3536_v32, %v1749_v58  ;;  %v1553_v23 = vmul.f32 %v3538_v30, %v1537_v46  ;;  %v1609_v45 = vrot.slane %v3600_v36, %v3455_v63 }
 0x25f   : > { %v1689_v6 = vpop.permute.xlu0 %1688  ;;  %2653 = vpow2.f32 %v3493_v41  ;;  %v1664_v29 = vadd.f32 %v1660_v26, %v1628_v14  ;;  %v1785_v40 = vrot.slane %v3576_v10, %v3453_v62  ;;  %v1453_v57 = vrot.slane %v3514_v55, %v3435_v44 }
 0x260   : > { %v1842_v24 = vadd.f32 %v1838_v15, %v1806_v35  ;;  %v3648_v8 = vpop.eup %2649  ;;  %v1589_v32 = vmul.f32 %v3574_v19, %v1573_v47  ;;  %v1645_v30 = vrot.slane %v3600_v36, %v3457_v56  ;;  %v1849_v50 = vrot.slane %v3496_v27, %v3445_v42 }
 0x261   : > { %v1681_v41 = vrot.slane %v3600_v36, %v3465_v16  ;;  %v1700_v26 = vadd.f32 %v1696_v18, %v1664_v29  ;;  %v1804_v21 = vmul.f32 %v1795_v0, %v1785_v40  ;;  %v3657_v59 = vmul.f32 %v1617_v13, %v1609_v45 }
 0x262   : > { %v1479_v5 = vmul.f32 %v1469_v9, %v1453_v57  ;;  %v1831_v4 = vpop.permute.xlu1 %1830  ;;  %v3661_v19 = vmul.f32 %v1653_v51, %v1645_v30  ;;  %v1874_v58 = vmul.f32 %v1863_v2, %v1849_v50  ;;  %v1821_v11 = vrot.slane %v3576_v10, %v3443_v12 }
 0x263   : > { %v1725_v22 = vpop.permute.xlu0 %1724  ;;  %v3659_v43 = vpop.eup %2651  ;;  %v3663_v46 = vmul.f32 %v1689_v6, %v1681_v41  ;;  %v1736_v35 = vadd.f32 %v1732_v38, %v1700_v26  ;;  %v1717_v0 = vrot.slane %v3600_v36, %v3430_v52  ;;  %v1885_v13 = vrot.slane %v3496_v27, %v3455_v63 }
 0x264   : > { %v1441_v16 = vrot.slane %v3659_v43, %v3430_v52  ;;  %v1338_v9 = vrot.slane %v3659_v43, 7  ;;  %v1878_v51 = vadd.f32 %v1874_v58, %v1842_v24  ;;  %v1840_v18 = vmul.f32 %v1831_v4, %v1821_v11 }
 0x265   : > { %v1753_v47 = vrot.slane %v3648_v8, %v3435_v44  ;;  %v1772_v15 = vadd.f32 %v1768_v37, %v1736_v35  ;;  %v3677_v38 = vmul.f32 %v1725_v22, %v1717_v0  ;;  %v1857_v45 = vrot.slane %v3576_v10, %v3445_v42  ;;  %v3943_v37 = vld [vmem:[#allocation14_spill] sm:$0xff] }
 0x266   : > { %v1445_v14 = vmul.f32 %v1441_v16, %v3155_v20  ;;  %v1899_v2 = vpop.permute.xlu1 %1898  ;;  %v1789_v24 = vrot.slane %v3648_v8, %v3453_v62  ;;  %v1921_v57 = vrot.slane %v3496_v27, %v3457_v56  ;;  %v1825_v20 = vrot.slane %v3648_v8, %v3443_v12  ;;  %v3944_v16 = vld [vmem:[#allocation18_spill] sm:$0xff] }
 0x267   : > { %v1761_v6 = vpop.permute.xlu0 %1760  ;;  %v1910_v29 = vmul.f32 %v1899_v2, %v1885_v13  ;;  %v1808_v30 = vadd.f32 %v1804_v21, %v1772_v15  ;;  %v1324_v50 = vrot.slane %v3943_v37, 7  ;;  %v1893_v4 = vrot.slane %v3576_v10, %v3455_v63  ;;  %v3947_v2 = vld [vmem:[#allocation9_spill] sm:$0xff] }
 0x268   : > { %v3681_v40 = vmul.f32 %v1761_v6, %v1753_v47  ;;  %v1485_v44 = vadd.f32 %v1481_v61, %v1445_v14  ;;  %v1861_v22 = vrot.slane %v3648_v8, %v3445_v42  ;;  %v1326_v62 = vrot.slane %v3496_v27, 7 }
 0x269   : > { %v3690_v41 = vpop.eup %2653  ;;  %v1914_v26 = vadd.f32 %v1910_v29, %v1878_v51  ;;  %v1844_v21 = vadd.f32 %v1840_v18, %v1808_v30  ;;  %v3700_v0 = vmul.f32 7.0, %v3944_v16  ;;  %v3945_v51 = vld [vmem:[#allocation15_spill] sm:$0xff]  ;;  %v1897_v27 = vrot.slane %v3648_v8, %v3455_v63  ;;  %v3948_v30 = vld [vmem:[#allocation12_spill] sm:$0xff] }
 0x26a   : > { %v1521_v58 = vadd.f32 %v1517_v39, %v1485_v44  ;;  %v1433_v61 = vrot.slane %v3690_v41, %v3430_v52  ;;  %v1867_v11 = vpop.permute.xlu1 %1866  ;;  %v3946_v47 = vrot.slane %v3945_v51, 7  ;;  %v1327_v15 = vsel %vm1322_vm9, %v1324_v50, %v1326_v62 }
 0x26b   : > { %v1797_v35 = vpop.permute.xlu0 %1796  ;;  %v1876_v13 = vmul.f32 %v1867_v11, %v1857_v45  ;;  %v1353_v18 = vsel %vm1352_vm10, %v1327_v15, 0.0  ;;  %v3949_v45 = vsub.f32 -10000.0, %v3948_v30  ;;  %v1334_v11 = vrot.slane %v3540_v33, 7 }
 0x26c   : > { %v1325_v14 = vsel %vm1322_vm9, %v3946_v47, %v1324_v50  ;;  %v1557_v39 = vadd.f32 %v1553_v23, %v1521_v58  ;;  %v1443_v6 = vmul.f32 %v1433_v61, %v3947_v2  ;;  %v1328_v50 = vrot.slane %v3690_v41, 7 }
 0x26d   : > { %v1351_v52 = vsel %vm815_vm2, %v1325_v14, 0.0  ;;  %v1880_v29 = vadd.f32 %v1876_v13, %v1844_v21  ;;  %v1306_v37 = vmul.f32 1.442695, %v3949_v45  ;;  %v1336_v23 = vrot.slane %v3576_v10, 7 }
 0x26e   : > { %v1354_v44 = vadd.f32 %v1353_v18, %v1351_v52  ;;  %v1593_v16 = vadd.f32 %v1589_v32, %v1557_v39  ;;  %v1483_v62 = vadd.f32 %v1479_v5, %v1443_v6  ;;  %v1935_v51 = vpop.permute.xlu1 %1934  ;;  %v1805_v58 = vmul.f32 %v1797_v35, %v1789_v24  ;;  %v3950_v6 = vld [vmem:[#allocation16_spill] sm:$0xff] }
 0x26f   : > { %v1833_v47 = vpop.permute.xlu0 %1832  ;;  %v1946_v61 = vmul.f32 %v1935_v51, %v1921_v57  ;;  %2655 = vpow2.f32 %v1306_v37  ;;  %v1335_v33 = vsel %vm1322_vm9, %v1333_v60, %v1334_v11  ;;  %v1337_v32 = vsel %vm1322_vm9, %v1334_v11, %v1336_v23 }
 0x270   : > { %v1355_v14 = vrot.slane %v1354_v44, 4  ;;  %v1629_v21 = vadd.f32 %v3657_v59, %v1593_v16  ;;  %v1519_v13 = vadd.f32 %v3543_v1, %v1483_v62  ;;  %v1370_v39 = vsel %vm815_vm2, %v1335_v33, 0.0 }
 0x271   : > { %v3722_v15 = vadd.f32 %v1946_v61, %v1914_v26  ;;  %v1371_v24 = vsel %vm1352_vm10, %v1337_v32, 0.0  ;;  %v1301_v31 = vsub.f32 -10000.0, %v3950_v6  ;;  %v1929_v26 = vrot.slane %v3576_v10, %v3457_v56  ;;  %v3951_v61 = vld [vmem:[#allocation19_spill] sm:$0xff] }
 0x272   : > { %v1356_v5 = vadd.f32 %v1355_v14, %v1354_v44  ;;  %v1555_v57 = vadd.f32 %v3546_v17, %v1519_v13  ;;  %v1665_v35 = vadd.f32 %v3661_v19, %v1629_v21  ;;  %v1903_v59 = vpop.permute.xlu1 %1902  ;;  %v1372_v1 = vadd.f32 %v1371_v24, %v1370_v39 }
 0x273   : > { %v1869_v2 = vpop.permute.xlu0 %1868  ;;  %v1912_v52 = vmul.f32 %v1903_v59, %v1893_v4  ;;  %v1339_v18 = vrot.slane %v3600_v36, 7  ;;  %v1308_v17 = vmul.f32 1.442695, %v1301_v31  ;;  %v1341_v4 = vrot.slane %v3648_v8, 7 }
 0x274   : > { %v1357_v60 = vrot.slane %v1356_v5, 2  ;;  %v1591_v44 = vadd.f32 %v3549_v25, %v1555_v57  ;;  %v1701_v30 = vadd.f32 %v3663_v46, %v1665_v35  ;;  %v1373_v45 = vrot.slane %v1372_v1, 4 }
 0x275   : > { %v1916_v37 = vadd.f32 %v1912_v52, %v1880_v29  ;;  %v1340_v11 = vsel %vm1322_vm9, %v1338_v9, %v1339_v18  ;;  %v1841_v25 = vmul.f32 %v1833_v47, %v1825_v20  ;;  %v1877_v51 = vmul.f32 %v1869_v2, %v1861_v22 }
 0x276   : > { %v1358_v19 = vadd.f32 %v1357_v60, %v1356_v5  ;;  %v1627_v16 = vadd.f32 %v3561_v7, %v1591_v44  ;;  %v1737_v10 = vadd.f32 %v3677_v38, %v1701_v30  ;;  %v1905_v36 = vpop.permute.xlu1 %1904  ;;  %v1374_v46 = vadd.f32 %v1373_v45, %v1372_v1  ;;  %v3952_v60 = vld [vmem:[#allocation17_spill] sm:$0xff] }
 0x277   : > { %v1939_v62 = vpop.permute.xlu0 %1938  ;;  %v1342_v43 = vsel %vm1322_vm9, %v1339_v18, %v1341_v4  ;;  %v1379_v7 = vsel %vm815_vm2, %v1340_v11, 0.0  ;;  %2657 = vpow2.f32 %v1308_v17  ;;  %v1913_v47 = vmul.f32 %v1905_v36, %v1897_v27 }
 0x278   : > { %v1359_v29 = vrot.slane %v1358_v19, 1  ;;  %v1948_v23 = vmul.f32 %v1939_v62, %v1929_v26  ;;  %v1663_v9 = vadd.f32 %v3951_v61, %v1627_v16  ;;  %v1773_v14 = vadd.f32 %v3681_v40, %v1737_v10  ;;  %v3955_v10 = vld [vmem:[#allocation11_spill] sm:$0xff]  ;;  %v3956_v62 = vld [vmem:[#allocation13_spill] sm:$0xff] }
 0x279   : > { %v1375_v21 = vrot.slane %v1374_v46, 2  ;;  %v2656_v38 = vpop.eup %2655  ;;  %v1380_v12 = vsel %vm1352_vm10, %v1342_v43, 0.0  ;;  %v1933_v57 = vrot.slane %v3648_v8, %v3457_v56  ;;  %v1331_v27 = vrot.slane %v3530_v28, 7 }
 0x27a   : > { %v1360_v13 = vadd.f32 %v1359_v29, %v1358_v19  ;;  %v1952_v33 = vadd.f32 %v1948_v23, %v1916_v37  ;;  %v1699_v20 = vadd.f32 %v3597_v53, %v1663_v9  ;;  %v1809_v22 = vadd.f32 %v1805_v58, %v1773_v14  ;;  %v1941_v5 = vpop.permute.xlu1 %1940 }
 0x27b   : > { %v1376_v32 = vadd.f32 %v1375_v21, %v1374_v46  ;;  %v1390_v39 = vmul.f32 7.0, %v2656_v38  ;;  %v1381_v24 = vadd.f32 %v1380_v12, %v1379_v7  ;;  %v1329_v53 = vrot.slane %v3514_v55, 7 }
 0x27c   : > { %v1392_v40 = vadd.f32 %v3700_v0, %v1360_v13  ;;  %v1735_v35 = vadd.f32 %v3604_v54, %v1699_v20  ;;  %v1845_v59 = vadd.f32 %v1841_v25, %v1809_v22  ;;  %v1949_v1 = vmul.f32 %v1941_v5, %v1933_v57 }
 0x27d   : > { %v1377_v2 = vrot.slane %v1376_v32, 1  ;;  %v1382_v58 = vrot.slane %v1381_v24, 4  ;;  %v1330_v52 = vsel %vm1322_vm9, %v1328_v50, %v1329_v53  ;;  %v1332_v54 = vsel %vm1322_vm9, %v1329_v53, %v1331_v27  ;;  %v3953_v50 = vld [vmem:[#allocation10_spill] sm:$0xff] }
 0x27e   : > { %2659 = vrcp.f32 %v1392_v40  ;;  %v1771_v6 = vadd.f32 %v3607_v34, %v1735_v35  ;;  %v1881_v31 = vadd.f32 %v1877_v51, %v1845_v59  ;;  %v1361_v55 = vsel %vm815_vm2, %v1330_v52, 0.0  ;;  %v2561_v52 = vld [vmem:[%s3888_s11] sm:$0xff]  }
 0x27f   : > { %v1378_v0 = vadd.f32 %v1377_v2, %v1376_v32  ;;  %v1383_v8 = vadd.f32 %v1382_v58, %v1381_v24  ;;  %2661 = vpow2.f32 %v3952_v60  ;;  %v1362_v44 = vsel %vm1352_vm10, %v1332_v54, 0.0 }
 0x280   : > { %v1917_v26 = vadd.f32 %v1913_v47, %v1881_v31  ;;  %v1807_v30 = vadd.f32 %v3614_v48, %v1771_v6  ;;  %v1925_v34 = vrot.slane %v3530_v28, %v3457_v56  ;;  %v1363_v41 = vadd.f32 %v1362_v44, %v1361_v55  ;;  %v2559_v31 = vld [vmem:[%s3886_s9] sm:$0xff]  }
 0x281   : > { %v1394_v18 = vadd.f32 %v1390_v39, %v1378_v0  ;;  %v1384_v45 = vrot.slane %v1383_v8, 2  ;;  %v1875_v17 = vmul.f32 %v3953_v50, %v1853_v3  ;;  %v2658_v11 = vpop.eup %2657  ;;  %v3954_v48 = vrot.slane %v3530_v28, %v3455_v63  ;;  %v2673_v39 = vld [vmem:[%s2899_s27] sm:$0xff]  ;;  %2469 = vmatpush3.bf16.msra.mxu1 %v2559_v31  ;;  %v2560_v0 = vld [vmem:[%s3886_s9 + $0x8] sm:$0xff]   ;;  %v2563_v50 = vld [vmem:[%s3888_s11 + $0x10] sm:$0xff]   ;;  %s2680_s27 = scalar_lea.vmem %s2679_s24, 256 }
 0x282   : > { %v1953_v37 = vadd.f32 %v1949_v1, %v1917_v26  ;;  %v1843_v19 = vadd.f32 %v3617_v49, %v1807_v30  ;;  %v1364_v16 = vrot.slane %v1363_v41, 4  ;;  %v1947_v51 = vmul.f32 %v3956_v62, %v1925_v34  ;;  %v2364_v30 = vld [vmem:[%s3885_s8] ss:$0 sm:$0xff]  ;;  %p2682_p1 = scmp.lt.s32.totalorder %s2680_s27, %s2674_s25 }
 0x283   : > { %2663 = vrcp.f32 %v1394_v18  ;;  %v1385_v4 = vadd.f32 %v1384_v45, %v1383_v8  ;;  %v1911_v25 = vmul.f32 %v3955_v10, %v3954_v48  ;;  %v1391_v23 = vmul.f32 7.0, %v2658_v11  ;;  %v2562_v8 = vld [vmem:[%s3888_s11 + $0x8] sm:$0xff]   ;;  %v2363_v18 = vld [vmem:[%s3884_s7] ss:$0 sm:$0xff] }
 0x284   : > { %v1879_v56 = vadd.f32 %v1875_v17, %v1843_v19  ;;  %v1365_v46 = vadd.f32 %v1364_v16, %v1363_v41  ;;  %v3957_v40 = vmov 0.0   ;;  %v2564_v17 = vld [vmem:[%s3888_s11 + $0x18] sm:$0xff]   ;;  %p2683_p2 = por %p2682_p1, %p2681_p0 }
 0x285   : > { %v1386_v36 = vrot.slane %v1385_v4, 1  ;;  %2470 = vmatprep.subr.bf16.mxu1 %v3957_v40 }
 0x286   : > { %v1915_v42 = vadd.f32 %v1911_v25, %v1879_v56  ;;  %v1366_v43 = vrot.slane %v1365_v46, 2  ;;  %2471 = vmatpush3.bf16.msra.mxu1 %v2560_v0  ;;  %v2369_v56 = vld [vmem:[%s3889_s12] ss:$0 sm:$0xff]  ;;  %p2684_p3 = pnand %p2683_p2, %p2677_p13 }
 0x287   : > { %v1387_v3 = vadd.f32 %v1386_v36, %v1385_v4 }
 0x288   : > { %v2660_v29 = vpop.eup %2659  ;;  %v1951_v61 = vadd.f32 %v1947_v51, %v1915_v42  ;;  %v1367_v21 = vadd.f32 %v1366_v43, %v1365_v46 }
 0x289   : > { %v1954_v49 = vmul.f32 %v2660_v29, %v3722_v15  ;;  %v2662_v9 = vpop.eup %2661  ;;  %v1395_v14 = vadd.f32 %v1391_v23, %v1387_v3 }
 0x28a   : > { %v1368_v63 = vrot.slane %v1367_v21, 1  ;;  %v1389_v13 = vmul.f32 7.0, %v2662_v9 }
 0x28b   : > { %1958 = vxpose.xlu0.b32.start [1/4] (short) (narrow) %v1954_v49, 8  ;;  %2665 = vrcp.f32 %v1395_v14 }
 0x28c   : > { %v1369_v38 = vadd.f32 %v1368_v63, %v1367_v21 }
 0x28d   : > { %v2664_v28 = vpop.eup %2663 }
 0x28e   : > { %v1956_v7 = vmul.f32 %v2664_v28, %v1952_v33  ;;  %v1393_v12 = vadd.f32 %v1389_v13, %v1369_v38  ;;  %v2376_v13 = vld [vmem:[%s3891_s14] ss:$0 sm:$0xff] }
 0x290   : > { %2667 = vrcp.f32 %v1393_v12 }
 0x295   : > { %v2666_v20 = vpop.eup %2665 }
 0x296   : > { %v1957_v22 = vmul.f32 %v2666_v20, %v1953_v37  ;;  %v2365_v37 = vld [vmem:[%s3887_s10] ss:$0 sm:$0xff] }
 0x29a   : > { %v2668_v47 = vpop.eup %2667 }
 0x29b   : > { %v1955_v32 = vmul.f32 %v2668_v47, %v1951_v61 }
 0x29d   : > { %1959 = vxpose.xlu0.b32.cont [2/4] (short) (narrow) %v1955_v32, 8 }
 0x2a1   : > { %1960 = vxpose.xlu0.b32.cont [3/4] (short) (narrow) %v1956_v7, 8  ;;  %v2375_v7 = vld [vmem:[%s3890_s13] ss:$0 sm:$0xff] }
 0x2a5   : > { %1961 = vxpose.xlu0.b32.end [4/4] (short) (narrow) %v1957_v22, 8 }
 0x319   : > { %v1974_v15 = vpop.trf.xlu0 }
 0x31a   : > { %v1990_v5 = vpack.c.bf16 %v1974_v15, %v1974_v15 }
 0x31c   : > { %2465 = vmatmul.mubr.msk.bf16.vlgmr.msra.gmra.mrb[12].mxu0 %vm554_vm1, %v1990_v5 }
 0x31d   : > { %2484 = vmatprep.mubr.msk.bf16.mxu0 %vm2739_vm0, %v3957_v40  ;;  %2477 = vmatpush3.bf16.msra.mxu0 %v2561_v52 }
 0x31e   : > { %2478 = vmatprep.subr.bf16.mxu0 %v3957_v40 }
 0x321   : > { %2479 = vmatpush3.bf16.msra.mxu0 %v2562_v8 }
 0x322   : > { %2480 = vmatprep.subr.bf16.mxu0 %v3957_v40 }
 0x325   : > { %2481 = vmatpush3.bf16.msra.mxu0 %v2563_v50 }
 0x326   : > { %2482 = vmatprep.subr.bf16.mxu0 %v3957_v40 }
 0x329   : > { %2483 = vmatpush3.bf16.msra.mxu0 %v2564_v17 }
 0x3ef   : > { %v2044_v33 = vpop.f32.mrb[12].mxu0 }
 0x3f0   : > { %v2045_v24 = vadd.f32 %v2673_v39, %v2044_v33  ;;  %v2466_v57 = vpop.f32.mrb[13].mxu0 }
 0x3f1   : > { %v2047_v35 = vpop.f32.mrb[14].mxu0 }
 0x3f2   : > { %v2467_v59 = vpop.f32.mrb[15].mxu0  ;;  %v2052_v2 = vsel %vm554_vm1, %v2045_v24, 0.0 }
 0x3f3   : > { %2053 = vadd.xlane.f32.xlu1 %v2052_v2 }
 0x480   : > { %v2054_v53 = vpop.xlane.xlu1 %2053 }
 0x481   : > { %v2056_v58 = vmul.f32 0.03125, %v2054_v53 }
 0x483   : > { %v2057_v1 = vsub.f32 %v2045_v24, %v2056_v58 }
 0x485   : > { %v2058_v27 = vmul.f32 %v2057_v1, %v2057_v1 }
 0x487   : > { %v2059_v6 = vsel %vm554_vm1, %v2058_v27, 0.0 }
 0x488   : > { %2060 = vadd.xlane.f32.xlu1 %v2059_v6 }
 0x515   : > { %v2061_v60 = vpop.xlane.xlu1 %2060 }
 0x516   : > { %v2062_v54 = vmul.f32 0.03125, %v2061_v60 }
 0x518   : > { %v2063_v55 = vadd.f32 1e-06, %v2062_v54 }
 0x51a   : > { %2669 = vrsqrt.f32 %v2063_v55 }
 0x524   : > { %v2670_v26 = vpop.eup %2669 }
 0x525   : > { %v2065_v44 = vmul.f32 %v2670_v26, %v2057_v1 }
 0x527   : > { %v2072_v34 = vmul.f32 %v2363_v18, %v2065_v44 }
 0x529   : > { %v2079_v45 = vadd.f32 %v2364_v30, %v2072_v34 }
 0x52b   : > { %v2080_v41 = vpack.c.bf16 %v2079_v45, %v2079_v45 }
 0x52d   : > { %2473 = vmatmul.mubr.msk.bf16.vlgmr.msra.gmra.mrb[20].mxu1 %vm554_vm1, %v2080_v41 }
 0x600   : > { %v2141_v19 = vpop.f32.mrb[20].mxu1 }
 0x601   : > { %v2142_v11 = vadd.f32 %v2365_v37, %v2141_v19  ;;  %v2474_v4 = vpop.f32.mrb[21].mxu1 }
 0x602   : > { %v2144_v16 = vpop.f32.mrb[22].mxu1 }
 0x603   : > { %v2147_v48 = vmax.f32 %v2142_v11, 0.0  ;;  %v2475_v10 = vpop.f32.mrb[23].mxu1 }
 0x605   : > { %v2148_v25 = vpack.c.bf16 %v2147_v48, %v2147_v48 }
 0x607   : > { %2485 = vmatmul.mubr.msk.bf16.vlgmr.msra.gmra.mrb[16].mxu0 %vm2188_vm11, %v2148_v25 }
 0x6da   : > { %v2226_v36 = vpop.f32.mrb[16].mxu0 }
 0x6db   : > { %v2227_v46 = vadd.f32 %v2369_v56, %v2226_v36  ;;  %v2486_v62 = vpop.f32.mrb[17].mxu0 }
 0x6dc   : > { %v2229_v51 = vpop.f32.mrb[18].mxu0 }
 0x6dd   : > { %v2487_v42 = vpop.f32.mrb[19].mxu0  ;;  %v2232_v29 = vadd.f32 %v2227_v46, %v2079_v45 }
 0x6df   : > { %v2235_v3 = vsel %vm554_vm1, %v2232_v29, 0.0 }
 0x6e0   : > { %2236 = vadd.xlane.f32.xlu1 %v2235_v3 }
 0x76d   : > { %v2237_v23 = vpop.xlane.xlu1 %2236 }
 0x76e   : > { %v2238_v43 = vmul.f32 0.03125, %v2237_v23 }
 0x770   : > { %v2239_v49 = vsub.f32 %v2232_v29, %v2238_v43 }
 0x772   : > { %v2240_v61 = vmul.f32 %v2239_v49, %v2239_v49 }
 0x774   : > { %v2241_v9 = vsel %vm554_vm1, %v2240_v61, 0.0 }
 0x775   : > { %2242 = vadd.xlane.f32.xlu0 %v2241_v9 }
 0x802   : > { %v2243_v14 = vpop.xlane.xlu0 %2242 }
 0x803   : > { %v2244_v21 = vmul.f32 0.03125, %v2243_v14 }
 0x805   : > { %v2245_v63 = vadd.f32 1e-06, %v2244_v21 }
 0x807   : > { %2671 = vrsqrt.f32 %v2245_v63 }
 0x811   : > { %v2672_v28 = vpop.eup %2671 }
 0x812   : > { %v2247_v38 = vmul.f32 %v2672_v28, %v2239_v49 }
 0x814   : > { %v2254_v12 = vmul.f32 %v2375_v7, %v2247_v38 }
 0x816   : > { %v2261_v20 = vadd.f32 %v2376_v13, %v2254_v12 }
 0x818   : > { %2262 = vst.msk [vmem:[%s485_s16] sm:$0xff] %vm554_vm1, %v2261_v20 }
 0x819   : > { %2687 = shalt.err (!%p2684_p3)
}
 0x81a   : > { %s2688_s20 = scalar_lea.hbm %s3834_s1, 128  ;;  %s2692_s16 = scalar_lea.hbm %s3892_s15, 256 }
 0x81b   : > { %p2689_p4 = scmp.ne.s32.totalorder %s3834_s1, %s2688_s20  ;;  %p2693_p9 = scmp.lt.u32.totalorder %s3834_s1, %s3892_s15 }
 0x81c   : > { %p2694_p10 = scmp.lt.u32.totalorder %s2692_s16, %s2688_s20  ;;  %p2696_p12 = scmp.lt.u32.totalorder %s2688_s20, %s3834_s1 }
 0x81d   : > { %p2690_p7 = pnand %p2689_p4, %p2875_p5 }
 0x81e   : > { %p2695_p11 = por %p2694_p10, %p2693_p9 }
 0x81f   : > { %p2691_p8 = pneg %p2690_p7 }
 0x820   : > { %p2697_p13 = por %p2696_p12, %p2695_p11 }
 0x822   : > { %p2698_p0 = pnand %p2697_p13, %p2691_p8 }
 0x824   : > { %2701 = shalt.err (!%p2698_p0)
}
 0x825   : > { %2492 = dma.vmem_to_hbm [thread:$0]  (%p2875_p5), %s3836_s29, 128, %s3834_s1, %s2264_s0  }
 0x826 PF: > { %p2498_p1 = scmp.ge.s32.totalorder %s2736_s21, 2  ;;  %s2289_s22 = sand.u32 1, %s2724_s18  }
 0x827   : > { %s2290_s24 = scalar_lea.sflag [#allocation3], %s2289_s22 }
 0x828   : > { %p2495_p2 = pnand %p2498_p1, %p2879_p6 }
 0x82a   : > { %2719 = dma.done.wait (!%p2495_p2), %s2290_s24, 128  }
 0x82b   : > { %2721 = vsyncadd (!%p2495_p2), %s2290_s24, 4294967168  ;;  %s3959_s21 = sld [smem:[#allocation6_spill]]  ;;  %s3960_s27 = sld [smem:[#allocation5_spill]] }
 0x82c   : > { %s3961_s20 = sld [smem:[#allocation7_spill]]  ;;  %s3962_s18 = smov %s2728_s19 }
 0x831   : > { %p25_p3 = scmp.ge.s32.totalorder %s3959_s21, 4   ;;  %s3963_s19 = smov %s3960_s27 }
 0x833   :  { %27 = sbr.rel (!%p25_p3) target bundleno = 6 (0x6), region = 115 }
 0x83a   :  { %2295 = vsyncpa [#allocation3], 1 }
 0x83b   :  { %2297 = vsyncpa [#allocation3 + $0x1], 1 }

</bundles_post_ra>
